<compile_context>
chip_gen: v7x
topology: tpu7x:2x2x1
jax: 0.10.0
libtpu: 0.0.40
codegen_flags: <defaults>
</compile_context>

<pallas_src>
from functools import partial
from typing import NamedTuple

import jax
import jax.numpy as jnp
from jax import lax
from jax.experimental import pallas as pl
from jax.experimental.pallas import tpu as pltpu

LN_EPS = 1e-5  # torch.nn.LayerNorm default


# --------------------------- parameter packing ------------------------------ #
class PackedParams(NamedTuple):
    w_slab: jax.Array      # (Rw, 128) bf16 weight slab
    b_slab: jax.Array      # (Rb, 128) f32 bias / LayerNorm slab
    w_layout: dict         # name -> (row_offset, n_rows, n_cols)  (static ints)
    b_layout: dict         # name -> (row_offset, n_rows, n_cols)  (static ints)


def _round_up(x, m):
    return -(-x // m) * m


def _params_from_raw(weights):
    """Fuse Q|K|V per attention block; return a dict of plain f32 arrays."""
    (m_wq, m_wk, m_wv, m_bq, m_bk, m_bv, m_wo, m_bo,
     c_wq, c_wk, c_wv, c_bq, c_bk, c_bv, c_wo, c_bo,
     ln1_g, ln1_b, ln2_g, ln2_b, ln3_g, ln3_b,
     ff_w1, ff_b1, ff_w2, ff_b2) = weights
    return dict(
        m_wqkv=jnp.concatenate([m_wq, m_wk, m_wv], axis=1),
        m_bqkv=jnp.concatenate([m_bq, m_bk, m_bv], axis=1),
        m_wo=m_wo, m_bo=m_bo,
        c_wqkv=jnp.concatenate([c_wq, c_wk, c_wv], axis=1),
        c_bqkv=jnp.concatenate([c_bq, c_bk, c_bv], axis=1),
        c_wo=c_wo, c_bo=c_bo,
        ff_w1=ff_w1, ff_b1=ff_b1, ff_w2=ff_w2, ff_b2=ff_b2,
        ln1_g=ln1_g, ln1_b=ln1_b,
        ln2_g=ln2_g, ln2_b=ln2_b,
        ln3_g=ln3_g, ln3_b=ln3_b,
    )


_W_NAMES = ('m_wqkv', 'c_wqkv', 'm_wo', 'c_wo', 'ff_w1', 'ff_w2')
_B_NAMES = ('m_bqkv', 'c_bqkv', 'm_bo', 'c_bo', 'ff_b1', 'ff_b2',
            'ln1_g', 'ln1_b', 'ln2_g', 'ln2_b', 'ln3_g', 'ln3_b')


def _build_slab(p, names, dtype):
    lanes = _round_up(max(p[n].shape[1] for n in names), 128)
    layout, blocks, row = {}, [], 0
    for n in names:
        a = p[n]
        r, c = a.shape
        layout[n] = (row, r, c)
        blocks.append(jnp.pad(a, ((0, 0), (0, lanes - c))))
        row += r
    slab = jnp.concatenate(blocks, axis=0)
    pad_rows = _round_up(row, 8) - row
    if pad_rows:
        slab = jnp.pad(slab, ((0, pad_rows), (0, 0)))
    return slab.astype(dtype), layout


def pack_params(weights):
    """One-time (init-time) packing: fuse QKV, stack everything into 2 slabs."""
    p = _params_from_raw(weights)
    w_slab, w_layout = _build_slab(p, _W_NAMES, jnp.bfloat16)
    b_slab, b_layout = _build_slab(p, _B_NAMES, jnp.float32)
    return PackedParams(w_slab, b_slab, w_layout, b_layout)


def _gather_params(w, b, w_layout, b_layout):
    """Static slicing of the two slabs back into named parameter views."""
    out = {}
    for n in _W_NAMES:
        r0, nr, nc = w_layout[n]
        out[n] = w[r0:r0 + nr, :nc]
    for n in _B_NAMES:
        r0, nr, nc = b_layout[n]
        out[n] = b[r0:r0 + nr, :nc]
    return out


# ----------------------------- shared math body ----------------------------- #
def _layer_norm(x, gamma, beta):
    mu = jnp.mean(x, axis=-1, keepdims=True)
    var = jnp.mean(jnp.square(x - mu), axis=-1, keepdims=True)
    return (x - mu) * lax.rsqrt(var + LN_EPS) * gamma + beta


def _mha(x2d, w_qkv, b_qkv, wo, bo, *, n_heads, head_dim, B, S,
         causal, mm_dtype, recip):
    """Multi-head self-attention on folded rows.  x2d: (B*S, E) f32."""
    HD = n_heads * head_dim
    E_out = wo.shape[1]

    # Fused QKV projection -> one fat MXU matmul on the (B*S) row axis.
    qkv = jnp.dot(x2d.astype(mm_dtype), w_qkv.astype(mm_dtype),
                  preferred_element_type=jnp.float32) + b_qkv          # (B*S, 3HD)
    qkv = qkv.reshape(B, S, 3 * HD)

    scale = 1.0 / float(head_dim) ** 0.5
    q = qkv[:, :, :HD] * scale
    k = qkv[:, :, HD:2 * HD]
    v = qkv[:, :, 2 * HD:]

    if causal:
        row = lax.broadcasted_iota(jnp.int32, (S, S), 0)
        col = lax.broadcasted_iota(jnp.int32, (S, S), 1)
        big_neg = jnp.float32(jnp.finfo(jnp.float32).min) * 0.5        # finite
        neg_mask = jnp.where(col <= row, jnp.float32(0.0), big_neg)    # (S, S)

    out = jnp.zeros((B * S, E_out), jnp.float32)
    for h in range(n_heads):  # static unroll; n_heads is tiny
        sl = slice(h * head_dim, (h + 1) * head_dim)
        qh = q[:, :, sl].astype(mm_dtype)
        kh = k[:, :, sl].astype(mm_dtype)
        vh = v[:, :, sl].astype(mm_dtype)
        # Contract last dims directly (no k.T -> no per-head XLU transpose).
        s = jnp.einsum('bqd,bkd->bqk', qh, kh,
                       preferred_element_type=jnp.float32)             # (B,S,S) f32
        if causal:
            s = s + neg_mask                                           # broadcast over B
        s = s - jnp.max(s, axis=-1, keepdims=True)
        p = jnp.exp(s)
        p = p * recip(jnp.sum(p, axis=-1, keepdims=True))              # EUP recip in-kernel
        ctx = jnp.einsum('bqk,bkd->bqd', p.astype(mm_dtype), vh,
                         preferred_element_type=jnp.float32)           # (B,S,D) f32
        ctx2d = ctx.reshape(B * S, head_dim)
        # Per-head output projection accumulate (avoids lane-interleave concat).
        out = out + jnp.dot(ctx2d.astype(mm_dtype), wo[sl, :].astype(mm_dtype),
                            preferred_element_type=jnp.float32)
    return out + bo


def _decoding_body(enc2d, y2d, p, *, n_heads, head_dim, B, S, mm_dtype, recip):
    """enc2d, y2d: (B*S, E) f32.  p: dict of parameter views."""
    # 1) masked multi-head self-attention on y
    mha1 = _mha(y2d, p['m_wqkv'], p['m_bqkv'], p['m_wo'], p['m_bo'],
                n_heads=n_heads, head_dim=head_dim, B=B, S=S,
                causal=True, mm_dtype=mm_dtype, recip=recip)
    n1 = _layer_norm(y2d + mha1, p['ln1_g'], p['ln1_b'])

    # 2) (un-masked) multi-head self-attention on encoder_x + n1
    mha2 = _mha(enc2d + n1, p['c_wqkv'], p['c_bqkv'], p['c_wo'], p['c_bo'],
                n_heads=n_heads, head_dim=head_dim, B=B, S=S,
                causal=False, mm_dtype=mm_dtype, recip=recip)
    n2 = _layer_norm(mha2 + n1 + enc2d, p['ln2_g'], p['ln2_b'])

    # 3) feed-forward + final layer norm
    h1 = jnp.maximum(
        jnp.dot(n2.astype(mm_dtype), p['ff_w1'].astype(mm_dtype),
                preferred_element_type=jnp.float32) + p['ff_b1'], 0.0)
    ff = jnp.dot(h1.astype(mm_dtype), p['ff_w2'].astype(mm_dtype),
                 preferred_element_type=jnp.float32) + p['ff_b2']
    return _layer_norm(ff + n2, p['ln3_g'], p['ln3_b'])


# --------------------------------- kernel ----------------------------------- #
def decoding_layer_kernel(enc_ref, y_ref, w_ref, b_ref, out_ref, *,
                          n_heads, head_dim, B, S, w_layout, b_layout):
    # Load the two slabs once, then take static (zero-cost) parameter views.
    p = _gather_params(w_ref[...], b_ref[...], w_layout, b_layout)
    out_ref[...] = _decoding_body(
        enc_ref[...], y_ref[...], p,
        n_heads=n_heads, head_dim=head_dim, B=B, S=S,
        mm_dtype=jnp.bfloat16,
        recip=lambda x: pl.reciprocal(x, approx=True))


# ------------------------------- wrapper ------------------------------------ #
def decoding_layer(encoder_x, y, packed: PackedParams, *, n_heads, head_dim):
    B, S, E = y.shape
    # Fold (B, S) -> rows in the wrapper (free on HBM); single kernel call,
    # all operands fully resident in VMEM (no grid, no pipelining).
    enc2d = encoder_x.reshape(B * S, E)
    y2d = y.reshape(B * S, E)

    vmem = pl.BlockSpec(memory_space=pltpu.MemorySpace.VMEM)
    out2d = pl.pallas_call(
        partial(decoding_layer_kernel, n_heads=n_heads, head_dim=head_dim,
                B=B, S=S, w_layout=packed.w_layout, b_layout=packed.b_layout),
        out_shape=jax.ShapeDtypeStruct((B * S, E), jnp.float32),
        in_specs=[vmem, vmem, vmem, vmem],
        out_specs=vmem,
    )(enc2d, y2d, packed.w_slab, packed.b_slab)

    # `matrix` is None because forward() is called with return_matrix=False.
    return out2d.reshape(B, S, E), None


# --------------------------- parameter creation ----------------------------- #
def init_weights(key, n_heads, head_dim, emb, ff_inner):
    """Deterministic synthetic init mirroring torch.nn.Linear/LayerNorm shapes."""
    HD = n_heads * head_dim

    def linear(k, fan_in, fan_out):
        kw, kb = jax.random.split(k)
        bound = 1.0 / (fan_in ** 0.5)
        w = jax.random.uniform(kw, (fan_in, fan_out), jnp.float32, -bound, bound)
        b = jax.random.uniform(kb, (1, fan_out), jnp.float32, -bound, bound)
        return w, b

    ks = jax.random.split(key, 10)
    m_wq, m_bq = linear(ks[0], emb, HD)
    m_wk, m_bk = linear(ks[1], emb, HD)
    m_wv, m_bv = linear(ks[2], emb, HD)
    m_wo, m_bo = linear(ks[3], HD, emb)
    c_wq, c_bq = linear(ks[4], emb, HD)
    c_wk, c_bk = linear(ks[5], emb, HD)
    c_wv, c_bv = linear(ks[6], emb, HD)
    c_wo, c_bo = linear(ks[7], HD, emb)
    ln_g = jnp.ones((1, emb), jnp.float32)   # torch LayerNorm default
    ln_b = jnp.zeros((1, emb), jnp.float32)
    ff_w1, ff_b1 = linear(ks[8], emb, ff_inner)
    ff_w2, ff_b2 = linear(ks[9], ff_inner, emb)

    return (m_wq, m_wk, m_wv, m_bq, m_bk, m_bv, m_wo, m_bo,
            c_wq, c_wk, c_wv, c_bq, c_bk, c_bv, c_wo, c_bo,
            ln_g, ln_b, ln_g, ln_b, ln_g, ln_b,
            ff_w1, ff_b1, ff_w2, ff_b2)


# --------------------------- pure-JAX references ----------------------------- #
def reference_matched(encoder_x, y, packed, *, n_heads, head_dim):
    """Same bf16-operand math as the kernel (exact divide), pure JAX."""
    B, S, E = y.shape
    p = _gather_params(packed.w_slab, packed.b_slab,
                       packed.w_layout, packed.b_layout)
    out2d = _decoding_body(encoder_x.reshape(B * S, E), y.reshape(B * S, E), p,
                           n_heads=n_heads, head_dim=head_dim, B=B, S=S,
                           mm_dtype=jnp.bfloat16, recip=lambda x: 1.0 / x)
    return out2d.reshape(B, S, E)


def reference_f32(encoder_x, y, weights, *, n_heads, head_dim):
    """Pure-f32 reference matching the PyTorch module semantics."""
    B, S, E = y.shape
    p = _params_from_raw(weights)
    out2d = _decoding_body(encoder_x.reshape(B * S, E), y.reshape(B * S, E), p,
                           n_heads=n_heads, head_dim=head_dim, B=B, S=S,
                           mm_dtype=jnp.float32, recip=lambda x: 1.0 / x)
    return out2d.reshape(B, S, E)


# ---------------------------------- main ------------------------------------ #
if __name__ == "__main__":
    # Module hyper-parameters (small, consistent with the forward pass)
    s_a_unit_count = 2     # number of attention heads
    dimensions = 16        # per-head dimension
    embedding_dims = 32
    ff_inner_dim = 64
    batch, seq = 2, 8

    key = jax.random.PRNGKey(0)
    k_enc, k_y, k_w = jax.random.split(key, 3)
    encoder_x = jax.random.normal(k_enc, (batch, seq, embedding_dims), jnp.float32)
    y = jax.random.normal(k_y, (batch, seq, embedding_dims), jnp.float32)
    weights = init_weights(k_w, s_a_unit_count, dimensions, embedding_dims, ff_inner_dim)

    # One-time packing (hoisted out of the per-forward-call path).
    packed = jax.tree_util.tree_map(jax.block_until_ready, pack_params(weights))

    out, matrix = decoding_layer(encoder_x, y, packed,
                                 n_heads=s_a_unit_count, head_dim=dimensions)
    out = jax.block_until_ready(out)

    assert out.shape == (batch, seq, embedding_dims)
    assert matrix is None

    # (1) kernel vs identical bf16-operand pure-JAX math (only delta: approx recip)
    ref_bf16 = jax.block_until_ready(
        reference_matched(encoder_x, y, packed,
                          n_heads=s_a_unit_count, head_dim=dimensions))
    assert jnp.allclose(out, ref_bf16, atol=2e-2, rtol=2e-2), \
        "kernel / bf16-matched reference mismatch"

    # (2) kernel vs pure-f32 semantics (validates the bf16 precision choice)
    ref_f32 = jax.block_until_ready(
        reference_f32(encoder_x, y, weights,
                      n_heads=s_a_unit_count, head_dim=dimensions))
    assert jnp.allclose(out, ref_f32, atol=1e-1, rtol=1e-1), \
        "kernel / f32 reference mismatch"

    print("KERNEL_OK")
</pallas_src>

<mosaic_0001>
module attributes {stable_mosaic.version = 11 : i64} {
  func.func @decoding_layer_kernel(%arg0: memref<16x32xf32, #tpu.memory_space<vmem>>, %arg1: memref<16x32xf32, #tpu.memory_space<vmem>>, %arg2: memref<224x128xbf16, #tpu.memory_space<vmem>>, %arg3: memref<16x128xf32, #tpu.memory_space<vmem>>, %arg4: memref<16x32xf32, #tpu.memory_space<vmem>>) attributes {dimension_semantics = [], scalar_prefetch = 0 : i64, scratch_operands = 0 : i64, tpu.core_type = #tpu.core_type<tc>} {
    %c0 = arith.constant 0 : index
    %c0_0 = arith.constant 0 : index
    %0 = vector.load %arg2[%c0, %c0_0] : memref<224x128xbf16, #tpu.memory_space<vmem>>, vector<224x128xbf16>
    %c0_1 = arith.constant 0 : index
    %c0_2 = arith.constant 0 : index
    %1 = vector.load %arg3[%c0_1, %c0_2] : memref<16x128xf32, #tpu.memory_space<vmem>>, vector<16x128xf32>
    %2 = vector.extract_strided_slice %0 {offsets = [0, 0], sizes = [32, 96], strides = [1, 1]} : vector<224x128xbf16> to vector<32x96xbf16>
    %3 = vector.extract_strided_slice %0 {offsets = [32, 0], sizes = [32, 96], strides = [1, 1]} : vector<224x128xbf16> to vector<32x96xbf16>
    %4 = vector.extract_strided_slice %0 {offsets = [64, 0], sizes = [32, 32], strides = [1, 1]} : vector<224x128xbf16> to vector<32x32xbf16>
    %5 = vector.extract_strided_slice %0 {offsets = [96, 0], sizes = [32, 32], strides = [1, 1]} : vector<224x128xbf16> to vector<32x32xbf16>
    %6 = vector.extract_strided_slice %0 {offsets = [128, 0], sizes = [32, 64], strides = [1, 1]} : vector<224x128xbf16> to vector<32x64xbf16>
    %7 = vector.extract_strided_slice %0 {offsets = [160, 0], sizes = [64, 32], strides = [1, 1]} : vector<224x128xbf16> to vector<64x32xbf16>
    %8 = vector.extract_strided_slice %1 {offsets = [0, 0], sizes = [1, 96], strides = [1, 1]} : vector<16x128xf32> to vector<1x96xf32>
    %9 = vector.extract_strided_slice %1 {offsets = [1, 0], sizes = [1, 96], strides = [1, 1]} : vector<16x128xf32> to vector<1x96xf32>
    %10 = vector.extract_strided_slice %1 {offsets = [2, 0], sizes = [1, 32], strides = [1, 1]} : vector<16x128xf32> to vector<1x32xf32>
    %11 = vector.extract_strided_slice %1 {offsets = [3, 0], sizes = [1, 32], strides = [1, 1]} : vector<16x128xf32> to vector<1x32xf32>
    %12 = vector.extract_strided_slice %1 {offsets = [4, 0], sizes = [1, 64], strides = [1, 1]} : vector<16x128xf32> to vector<1x64xf32>
    %13 = vector.extract_strided_slice %1 {offsets = [5, 0], sizes = [1, 32], strides = [1, 1]} : vector<16x128xf32> to vector<1x32xf32>
    %14 = vector.extract_strided_slice %1 {offsets = [6, 0], sizes = [1, 32], strides = [1, 1]} : vector<16x128xf32> to vector<1x32xf32>
    %15 = vector.extract_strided_slice %1 {offsets = [7, 0], sizes = [1, 32], strides = [1, 1]} : vector<16x128xf32> to vector<1x32xf32>
    %16 = vector.extract_strided_slice %1 {offsets = [8, 0], sizes = [1, 32], strides = [1, 1]} : vector<16x128xf32> to vector<1x32xf32>
    %17 = vector.extract_strided_slice %1 {offsets = [9, 0], sizes = [1, 32], strides = [1, 1]} : vector<16x128xf32> to vector<1x32xf32>
    %18 = vector.extract_strided_slice %1 {offsets = [10, 0], sizes = [1, 32], strides = [1, 1]} : vector<16x128xf32> to vector<1x32xf32>
    %19 = vector.extract_strided_slice %1 {offsets = [11, 0], sizes = [1, 32], strides = [1, 1]} : vector<16x128xf32> to vector<1x32xf32>
    %c0_3 = arith.constant 0 : index
    %c0_4 = arith.constant 0 : index
    %20 = vector.load %arg0[%c0_3, %c0_4] : memref<16x32xf32, #tpu.memory_space<vmem>>, vector<16x32xf32>
    %c0_5 = arith.constant 0 : index
    %c0_6 = arith.constant 0 : index
    %21 = vector.load %arg1[%c0_5, %c0_6] : memref<16x32xf32, #tpu.memory_space<vmem>>, vector<16x32xf32>
    %22 = arith.truncf %21 : vector<16x32xf32> to vector<16x32xbf16>
    %cst = arith.constant dense<0.000000e+00> : vector<16x96xf32>
    %23 = tpu.matmul %22, %2, %cst {dimension_numbers = #tpu.dot_dimension_numbers<[1], [0], [0], [1], [0, 0, 1, 1], [], []>} : vector<16x32xbf16>, vector<32x96xbf16>, vector<16x96xf32> -> vector<16x96xf32>
    %24 = vector.broadcast %8 : vector<1x96xf32> to vector<16x96xf32>
    %25 = arith.addf %23, %24 : vector<16x96xf32>
    %26 = vector.shape_cast %25 : vector<16x96xf32> to vector<2x8x96xf32>
    %27 = vector.extract_strided_slice %26 {offsets = [0, 0, 0], sizes = [2, 8, 32], strides = [1, 1, 1]} : vector<2x8x96xf32> to vector<2x8x32xf32>
    %cst_7 = arith.constant 2.500000e-01 : f32
    %28 = vector.broadcast %cst_7 : f32 to vector<2x8x32xf32>
    %29 = arith.mulf %27, %28 : vector<2x8x32xf32>
    %30 = vector.extract_strided_slice %26 {offsets = [0, 0, 32], sizes = [2, 8, 32], strides = [1, 1, 1]} : vector<2x8x96xf32> to vector<2x8x32xf32>
    %31 = vector.extract_strided_slice %26 {offsets = [0, 0, 64], sizes = [2, 8, 32], strides = [1, 1, 1]} : vector<2x8x96xf32> to vector<2x8x32xf32>
    %32 = tpu.iota {dimensions = array<i32: 0>} : vector<8x8xi32>
    %33 = tpu.iota {dimensions = array<i32: 1>} : vector<8x8xi32>
    %cst_8 = arith.constant -3.40282347E+38 : f32
    %cst_9 = arith.constant 5.000000e-01 : f32
    %34 = arith.mulf %cst_8, %cst_9 : f32
    %35 = arith.cmpi sle, %33, %32 : vector<8x8xi32>
    %cst_10 = arith.constant 0.000000e+00 : f32
    %36 = vector.broadcast %cst_10 : f32 to vector<8x8xf32>
    %37 = vector.broadcast %34 : f32 to vector<8x8xf32>
    %38 = arith.select %35, %36, %37 : vector<8x8xi1>, vector<8x8xf32>
    %cst_11 = arith.constant 0.000000e+00 : f32
    %39 = vector.broadcast %cst_11 : f32 to vector<16x32xf32>
    %40 = vector.extract_strided_slice %29 {offsets = [0, 0, 0], sizes = [2, 8, 16], strides = [1, 1, 1]} : vector<2x8x32xf32> to vector<2x8x16xf32>
    %41 = arith.truncf %40 : vector<2x8x16xf32> to vector<2x8x16xbf16>
    %42 = vector.extract_strided_slice %30 {offsets = [0, 0, 0], sizes = [2, 8, 16], strides = [1, 1, 1]} : vector<2x8x32xf32> to vector<2x8x16xf32>
    %43 = arith.truncf %42 : vector<2x8x16xf32> to vector<2x8x16xbf16>
    %44 = vector.extract_strided_slice %31 {offsets = [0, 0, 0], sizes = [2, 8, 16], strides = [1, 1, 1]} : vector<2x8x32xf32> to vector<2x8x16xf32>
    %45 = arith.truncf %44 : vector<2x8x16xf32> to vector<2x8x16xbf16>
    "tpu.trace_start"() <{level = 10 : i32, message = "bqd,bkd->bqk"}> : () -> ()
    %cst_12 = arith.constant dense<0.000000e+00> : vector<2x8x8xf32>
    %46 = tpu.matmul %41, %43, %cst_12 {dimension_numbers = #tpu.dot_dimension_numbers<[2], [2], [1], [1], [0, 0, 0, 1, 1, 1], [0], [0]>} : vector<2x8x16xbf16>, vector<2x8x16xbf16>, vector<2x8x8xf32> -> vector<2x8x8xf32>
    "tpu.trace_stop"() : () -> ()
    %47 = vector.shape_cast %38 : vector<8x8xf32> to vector<1x8x8xf32>
    %48 = vector.broadcast %47 : vector<1x8x8xf32> to vector<2x8x8xf32>
    %49 = arith.addf %46, %48 : vector<2x8x8xf32>
    %cst_13 = arith.constant dense<0xFF800000> : vector<2x8xf32>
    %50 = vector.multi_reduction <maximumf>, %49, %cst_13 [2] : vector<2x8x8xf32> to vector<2x8xf32>
    %51 = vector.shape_cast %50 : vector<2x8xf32> to vector<2x8x1xf32>
    %52 = vector.broadcast %51 : vector<2x8x1xf32> to vector<2x8x8xf32>
    %53 = arith.subf %49, %52 : vector<2x8x8xf32>
    %54 = math.exp %53 : vector<2x8x8xf32>
    %cst_14 = arith.constant dense<0.000000e+00> : vector<2x8xf32>
    %55 = vector.multi_reduction <add>, %54, %cst_14 [2] : vector<2x8x8xf32> to vector<2x8xf32>
    %56 = vector.shape_cast %55 : vector<2x8xf32> to vector<2x8x1xf32>
    %57 = tpu.reciprocal %56 {approx = true} : vector<2x8x1xf32> -> vector<2x8x1xf32>
    %58 = vector.broadcast %57 : vector<2x8x1xf32> to vector<2x8x8xf32>
    %59 = arith.mulf %54, %58 : vector<2x8x8xf32>
    %60 = arith.truncf %59 : vector<2x8x8xf32> to vector<2x8x8xbf16>
    "tpu.trace_start"() <{level = 10 : i32, message = "bqk,bkd->bqd"}> : () -> ()
    %cst_15 = arith.constant dense<0.000000e+00> : vector<2x8x16xf32>
    %61 = tpu.matmul %60, %45, %cst_15 {dimension_numbers = #tpu.dot_dimension_numbers<[2], [1], [1], [2], [0, 0, 0, 1, 1, 2], [0], [0]>} : vector<2x8x8xbf16>, vector<2x8x16xbf16>, vector<2x8x16xf32> -> vector<2x8x16xf32>
    "tpu.trace_stop"() : () -> ()
    %62 = vector.shape_cast %61 : vector<2x8x16xf32> to vector<16x16xf32>
    %63 = arith.truncf %62 : vector<16x16xf32> to vector<16x16xbf16>
    %64 = vector.extract_strided_slice %4 {offsets = [0, 0], sizes = [16, 32], strides = [1, 1]} : vector<32x32xbf16> to vector<16x32xbf16>
    %cst_16 = arith.constant dense<0.000000e+00> : vector<16x32xf32>
    %65 = tpu.matmul %63, %64, %cst_16 {dimension_numbers = #tpu.dot_dimension_numbers<[1], [0], [0], [1], [0, 0, 1, 1], [], []>} : vector<16x16xbf16>, vector<16x32xbf16>, vector<16x32xf32> -> vector<16x32xf32>
    %66 = arith.addf %39, %65 : vector<16x32xf32>
    %67 = vector.extract_strided_slice %29 {offsets = [0, 0, 16], sizes = [2, 8, 16], strides = [1, 1, 1]} : vector<2x8x32xf32> to vector<2x8x16xf32>
    %68 = arith.truncf %67 : vector<2x8x16xf32> to vector<2x8x16xbf16>
    %69 = vector.extract_strided_slice %30 {offsets = [0, 0, 16], sizes = [2, 8, 16], strides = [1, 1, 1]} : vector<2x8x32xf32> to vector<2x8x16xf32>
    %70 = arith.truncf %69 : vector<2x8x16xf32> to vector<2x8x16xbf16>
    %71 = vector.extract_strided_slice %31 {offsets = [0, 0, 16], sizes = [2, 8, 16], strides = [1, 1, 1]} : vector<2x8x32xf32> to vector<2x8x16xf32>
    %72 = arith.truncf %71 : vector<2x8x16xf32> to vector<2x8x16xbf16>
    "tpu.trace_start"() <{level = 10 : i32, message = "bqd,bkd->bqk"}> : () -> ()
    %cst_17 = arith.constant dense<0.000000e+00> : vector<2x8x8xf32>
    %73 = tpu.matmul %68, %70, %cst_17 {dimension_numbers = #tpu.dot_dimension_numbers<[2], [2], [1], [1], [0, 0, 0, 1, 1, 1], [0], [0]>} : vector<2x8x16xbf16>, vector<2x8x16xbf16>, vector<2x8x8xf32> -> vector<2x8x8xf32>
    "tpu.trace_stop"() : () -> ()
    %74 = vector.shape_cast %38 : vector<8x8xf32> to vector<1x8x8xf32>
    %75 = vector.broadcast %74 : vector<1x8x8xf32> to vector<2x8x8xf32>
    %76 = arith.addf %73, %75 : vector<2x8x8xf32>
    %cst_18 = arith.constant dense<0xFF800000> : vector<2x8xf32>
    %77 = vector.multi_reduction <maximumf>, %76, %cst_18 [2] : vector<2x8x8xf32> to vector<2x8xf32>
    %78 = vector.shape_cast %77 : vector<2x8xf32> to vector<2x8x1xf32>
    %79 = vector.broadcast %78 : vector<2x8x1xf32> to vector<2x8x8xf32>
    %80 = arith.subf %76, %79 : vector<2x8x8xf32>
    %81 = math.exp %80 : vector<2x8x8xf32>
    %cst_19 = arith.constant dense<0.000000e+00> : vector<2x8xf32>
    %82 = vector.multi_reduction <add>, %81, %cst_19 [2] : vector<2x8x8xf32> to vector<2x8xf32>
    %83 = vector.shape_cast %82 : vector<2x8xf32> to vector<2x8x1xf32>
    %84 = tpu.reciprocal %83 {approx = true} : vector<2x8x1xf32> -> vector<2x8x1xf32>
    %85 = vector.broadcast %84 : vector<2x8x1xf32> to vector<2x8x8xf32>
    %86 = arith.mulf %81, %85 : vector<2x8x8xf32>
    %87 = arith.truncf %86 : vector<2x8x8xf32> to vector<2x8x8xbf16>
    "tpu.trace_start"() <{level = 10 : i32, message = "bqk,bkd->bqd"}> : () -> ()
    %cst_20 = arith.constant dense<0.000000e+00> : vector<2x8x16xf32>
    %88 = tpu.matmul %87, %72, %cst_20 {dimension_numbers = #tpu.dot_dimension_numbers<[2], [1], [1], [2], [0, 0, 0, 1, 1, 2], [0], [0]>} : vector<2x8x8xbf16>, vector<2x8x16xbf16>, vector<2x8x16xf32> -> vector<2x8x16xf32>
    "tpu.trace_stop"() : () -> ()
    %89 = vector.shape_cast %88 : vector<2x8x16xf32> to vector<16x16xf32>
    %90 = arith.truncf %89 : vector<16x16xf32> to vector<16x16xbf16>
    %91 = vector.extract_strided_slice %4 {offsets = [16, 0], sizes = [16, 32], strides = [1, 1]} : vector<32x32xbf16> to vector<16x32xbf16>
    %cst_21 = arith.constant dense<0.000000e+00> : vector<16x32xf32>
    %92 = tpu.matmul %90, %91, %cst_21 {dimension_numbers = #tpu.dot_dimension_numbers<[1], [0], [0], [1], [0, 0, 1, 1], [], []>} : vector<16x16xbf16>, vector<16x32xbf16>, vector<16x32xf32> -> vector<16x32xf32>
    %93 = arith.addf %66, %92 : vector<16x32xf32>
    %94 = vector.broadcast %10 : vector<1x32xf32> to vector<16x32xf32>
    %95 = arith.addf %93, %94 : vector<16x32xf32>
    %96 = arith.addf %21, %95 : vector<16x32xf32>
    %cst_22 = arith.constant dense<0.000000e+00> : vector<16xf32>
    %97 = vector.multi_reduction <add>, %96, %cst_22 [1] : vector<16x32xf32> to vector<16xf32>
    %98 = vector.shape_cast %97 : vector<16xf32> to vector<16x1xf32>
    %cst_23 = arith.constant 3.200000e+01 : f32
    %99 = vector.broadcast %cst_23 : f32 to vector<16x1xf32>
    %100 = arith.divf %98, %99 : vector<16x1xf32>
    %101 = vector.broadcast %100 : vector<16x1xf32> to vector<16x32xf32>
    %102 = arith.subf %96, %101 : vector<16x32xf32>
    %103 = arith.mulf %102, %102 : vector<16x32xf32>
    %cst_24 = arith.constant dense<0.000000e+00> : vector<16xf32>
    %104 = vector.multi_reduction <add>, %103, %cst_24 [1] : vector<16x32xf32> to vector<16xf32>
    %105 = vector.shape_cast %104 : vector<16xf32> to vector<16x1xf32>
    %cst_25 = arith.constant 3.200000e+01 : f32
    %106 = vector.broadcast %cst_25 : f32 to vector<16x1xf32>
    %107 = arith.divf %105, %106 : vector<16x1xf32>
    %108 = vector.broadcast %100 : vector<16x1xf32> to vector<16x32xf32>
    %109 = arith.subf %96, %108 : vector<16x32xf32>
    %cst_26 = arith.constant 9.99999974E-6 : f32
    %110 = vector.broadcast %cst_26 : f32 to vector<16x1xf32>
    %111 = arith.addf %107, %110 : vector<16x1xf32>
    %112 = math.rsqrt %111 : vector<16x1xf32>
    %113 = vector.broadcast %112 : vector<16x1xf32> to vector<16x32xf32>
    %114 = arith.mulf %109, %113 : vector<16x32xf32>
    %115 = vector.broadcast %14 : vector<1x32xf32> to vector<16x32xf32>
    %116 = arith.mulf %114, %115 : vector<16x32xf32>
    %117 = vector.broadcast %15 : vector<1x32xf32> to vector<16x32xf32>
    %118 = arith.addf %116, %117 : vector<16x32xf32>
    %119 = arith.addf %20, %118 : vector<16x32xf32>
    %120 = arith.truncf %119 : vector<16x32xf32> to vector<16x32xbf16>
    %cst_27 = arith.constant dense<0.000000e+00> : vector<16x96xf32>
    %121 = tpu.matmul %120, %3, %cst_27 {dimension_numbers = #tpu.dot_dimension_numbers<[1], [0], [0], [1], [0, 0, 1, 1], [], []>} : vector<16x32xbf16>, vector<32x96xbf16>, vector<16x96xf32> -> vector<16x96xf32>
    %122 = vector.broadcast %9 : vector<1x96xf32> to vector<16x96xf32>
    %123 = arith.addf %121, %122 : vector<16x96xf32>
    %124 = vector.shape_cast %123 : vector<16x96xf32> to vector<2x8x96xf32>
    %125 = vector.extract_strided_slice %124 {offsets = [0, 0, 0], sizes = [2, 8, 32], strides = [1, 1, 1]} : vector<2x8x96xf32> to vector<2x8x32xf32>
    %cst_28 = arith.constant 2.500000e-01 : f32
    %126 = vector.broadcast %cst_28 : f32 to vector<2x8x32xf32>
    %127 = arith.mulf %125, %126 : vector<2x8x32xf32>
    %128 = vector.extract_strided_slice %124 {offsets = [0, 0, 32], sizes = [2, 8, 32], strides = [1, 1, 1]} : vector<2x8x96xf32> to vector<2x8x32xf32>
    %129 = vector.extract_strided_slice %124 {offsets = [0, 0, 64], sizes = [2, 8, 32], strides = [1, 1, 1]} : vector<2x8x96xf32> to vector<2x8x32xf32>
    %cst_29 = arith.constant 0.000000e+00 : f32
    %130 = vector.broadcast %cst_29 : f32 to vector<16x32xf32>
    %131 = vector.extract_strided_slice %127 {offsets = [0, 0, 0], sizes = [2, 8, 16], strides = [1, 1, 1]} : vector<2x8x32xf32> to vector<2x8x16xf32>
    %132 = arith.truncf %131 : vector<2x8x16xf32> to vector<2x8x16xbf16>
    %133 = vector.extract_strided_slice %128 {offsets = [0, 0, 0], sizes = [2, 8, 16], strides = [1, 1, 1]} : vector<2x8x32xf32> to vector<2x8x16xf32>
    %134 = arith.truncf %133 : vector<2x8x16xf32> to vector<2x8x16xbf16>
    %135 = vector.extract_strided_slice %129 {offsets = [0, 0, 0], sizes = [2, 8, 16], strides = [1, 1, 1]} : vector<2x8x32xf32> to vector<2x8x16xf32>
    %136 = arith.truncf %135 : vector<2x8x16xf32> to vector<2x8x16xbf16>
    "tpu.trace_start"() <{level = 10 : i32, message = "bqd,bkd->bqk"}> : () -> ()
    %cst_30 = arith.constant dense<0.000000e+00> : vector<2x8x8xf32>
    %137 = tpu.matmul %132, %134, %cst_30 {dimension_numbers = #tpu.dot_dimension_numbers<[2], [2], [1], [1], [0, 0, 0, 1, 1, 1], [0], [0]>} : vector<2x8x16xbf16>, vector<2x8x16xbf16>, vector<2x8x8xf32> -> vector<2x8x8xf32>
    "tpu.trace_stop"() : () -> ()
    %cst_31 = arith.constant dense<0xFF800000> : vector<2x8xf32>
    %138 = vector.multi_reduction <maximumf>, %137, %cst_31 [2] : vector<2x8x8xf32> to vector<2x8xf32>
    %139 = vector.shape_cast %138 : vector<2x8xf32> to vector<2x8x1xf32>
    %140 = vector.broadcast %139 : vector<2x8x1xf32> to vector<2x8x8xf32>
    %141 = arith.subf %137, %140 : vector<2x8x8xf32>
    %142 = math.exp %141 : vector<2x8x8xf32>
    %cst_32 = arith.constant dense<0.000000e+00> : vector<2x8xf32>
    %143 = vector.multi_reduction <add>, %142, %cst_32 [2] : vector<2x8x8xf32> to vector<2x8xf32>
    %144 = vector.shape_cast %143 : vector<2x8xf32> to vector<2x8x1xf32>
    %145 = tpu.reciprocal %144 {approx = true} : vector<2x8x1xf32> -> vector<2x8x1xf32>
    %146 = vector.broadcast %145 : vector<2x8x1xf32> to vector<2x8x8xf32>
    %147 = arith.mulf %142, %146 : vector<2x8x8xf32>
    %148 = arith.truncf %147 : vector<2x8x8xf32> to vector<2x8x8xbf16>
    "tpu.trace_start"() <{level = 10 : i32, message = "bqk,bkd->bqd"}> : () -> ()
    %cst_33 = arith.constant dense<0.000000e+00> : vector<2x8x16xf32>
    %149 = tpu.matmul %148, %136, %cst_33 {dimension_numbers = #tpu.dot_dimension_numbers<[2], [1], [1], [2], [0, 0, 0, 1, 1, 2], [0], [0]>} : vector<2x8x8xbf16>, vector<2x8x16xbf16>, vector<2x8x16xf32> -> vector<2x8x16xf32>
    "tpu.trace_stop"() : () -> ()
    %150 = vector.shape_cast %149 : vector<2x8x16xf32> to vector<16x16xf32>
    %151 = arith.truncf %150 : vector<16x16xf32> to vector<16x16xbf16>
    %152 = vector.extract_strided_slice %5 {offsets = [0, 0], sizes = [16, 32], strides = [1, 1]} : vector<32x32xbf16> to vector<16x32xbf16>
    %cst_34 = arith.constant dense<0.000000e+00> : vector<16x32xf32>
    %153 = tpu.matmul %151, %152, %cst_34 {dimension_numbers = #tpu.dot_dimension_numbers<[1], [0], [0], [1], [0, 0, 1, 1], [], []>} : vector<16x16xbf16>, vector<16x32xbf16>, vector<16x32xf32> -> vector<16x32xf32>
    %154 = arith.addf %130, %153 : vector<16x32xf32>
    %155 = vector.extract_strided_slice %127 {offsets = [0, 0, 16], sizes = [2, 8, 16], strides = [1, 1, 1]} : vector<2x8x32xf32> to vector<2x8x16xf32>
    %156 = arith.truncf %155 : vector<2x8x16xf32> to vector<2x8x16xbf16>
    %157 = vector.extract_strided_slice %128 {offsets = [0, 0, 16], sizes = [2, 8, 16], strides = [1, 1, 1]} : vector<2x8x32xf32> to vector<2x8x16xf32>
    %158 = arith.truncf %157 : vector<2x8x16xf32> to vector<2x8x16xbf16>
    %159 = vector.extract_strided_slice %129 {offsets = [0, 0, 16], sizes = [2, 8, 16], strides = [1, 1, 1]} : vector<2x8x32xf32> to vector<2x8x16xf32>
    %160 = arith.truncf %159 : vector<2x8x16xf32> to vector<2x8x16xbf16>
    "tpu.trace_start"() <{level = 10 : i32, message = "bqd,bkd->bqk"}> : () -> ()
    %cst_35 = arith.constant dense<0.000000e+00> : vector<2x8x8xf32>
    %161 = tpu.matmul %156, %158, %cst_35 {dimension_numbers = #tpu.dot_dimension_numbers<[2], [2], [1], [1], [0, 0, 0, 1, 1, 1], [0], [0]>} : vector<2x8x16xbf16>, vector<2x8x16xbf16>, vector<2x8x8xf32> -> vector<2x8x8xf32>
    "tpu.trace_stop"() : () -> ()
    %cst_36 = arith.constant dense<0xFF800000> : vector<2x8xf32>
    %162 = vector.multi_reduction <maximumf>, %161, %cst_36 [2] : vector<2x8x8xf32> to vector<2x8xf32>
    %163 = vector.shape_cast %162 : vector<2x8xf32> to vector<2x8x1xf32>
    %164 = vector.broadcast %163 : vector<2x8x1xf32> to vector<2x8x8xf32>
    %165 = arith.subf %161, %164 : vector<2x8x8xf32>
    %166 = math.exp %165 : vector<2x8x8xf32>
    %cst_37 = arith.constant dense<0.000000e+00> : vector<2x8xf32>
    %167 = vector.multi_reduction <add>, %166, %cst_37 [2] : vector<2x8x8xf32> to vector<2x8xf32>
    %168 = vector.shape_cast %167 : vector<2x8xf32> to vector<2x8x1xf32>
    %169 = tpu.reciprocal %168 {approx = true} : vector<2x8x1xf32> -> vector<2x8x1xf32>
    %170 = vector.broadcast %169 : vector<2x8x1xf32> to vector<2x8x8xf32>
    %171 = arith.mulf %166, %170 : vector<2x8x8xf32>
    %172 = arith.truncf %171 : vector<2x8x8xf32> to vector<2x8x8xbf16>
    "tpu.trace_start"() <{level = 10 : i32, message = "bqk,bkd->bqd"}> : () -> ()
    %cst_38 = arith.constant dense<0.000000e+00> : vector<2x8x16xf32>
    %173 = tpu.matmul %172, %160, %cst_38 {dimension_numbers = #tpu.dot_dimension_numbers<[2], [1], [1], [2], [0, 0, 0, 1, 1, 2], [0], [0]>} : vector<2x8x8xbf16>, vector<2x8x16xbf16>, vector<2x8x16xf32> -> vector<2x8x16xf32>
    "tpu.trace_stop"() : () -> ()
    %174 = vector.shape_cast %173 : vector<2x8x16xf32> to vector<16x16xf32>
    %175 = arith.truncf %174 : vector<16x16xf32> to vector<16x16xbf16>
    %176 = vector.extract_strided_slice %5 {offsets = [16, 0], sizes = [16, 32], strides = [1, 1]} : vector<32x32xbf16> to vector<16x32xbf16>
    %cst_39 = arith.constant dense<0.000000e+00> : vector<16x32xf32>
    %177 = tpu.matmul %175, %176, %cst_39 {dimension_numbers = #tpu.dot_dimension_numbers<[1], [0], [0], [1], [0, 0, 1, 1], [], []>} : vector<16x16xbf16>, vector<16x32xbf16>, vector<16x32xf32> -> vector<16x32xf32>
    %178 = arith.addf %154, %177 : vector<16x32xf32>
    %179 = vector.broadcast %11 : vector<1x32xf32> to vector<16x32xf32>
    %180 = arith.addf %178, %179 : vector<16x32xf32>
    %181 = arith.addf %180, %118 : vector<16x32xf32>
    %182 = arith.addf %181, %20 : vector<16x32xf32>
    %cst_40 = arith.constant dense<0.000000e+00> : vector<16xf32>
    %183 = vector.multi_reduction <add>, %182, %cst_40 [1] : vector<16x32xf32> to vector<16xf32>
    %184 = vector.shape_cast %183 : vector<16xf32> to vector<16x1xf32>
    %cst_41 = arith.constant 3.200000e+01 : f32
    %185 = vector.broadcast %cst_41 : f32 to vector<16x1xf32>
    %186 = arith.divf %184, %185 : vector<16x1xf32>
    %187 = vector.broadcast %186 : vector<16x1xf32> to vector<16x32xf32>
    %188 = arith.subf %182, %187 : vector<16x32xf32>
    %189 = arith.mulf %188, %188 : vector<16x32xf32>
    %cst_42 = arith.constant dense<0.000000e+00> : vector<16xf32>
    %190 = vector.multi_reduction <add>, %189, %cst_42 [1] : vector<16x32xf32> to vector<16xf32>
    %191 = vector.shape_cast %190 : vector<16xf32> to vector<16x1xf32>
    %cst_43 = arith.constant 3.200000e+01 : f32
    %192 = vector.broadcast %cst_43 : f32 to vector<16x1xf32>
    %193 = arith.divf %191, %192 : vector<16x1xf32>
    %194 = vector.broadcast %186 : vector<16x1xf32> to vector<16x32xf32>
    %195 = arith.subf %182, %194 : vector<16x32xf32>
    %cst_44 = arith.constant 9.99999974E-6 : f32
    %196 = vector.broadcast %cst_44 : f32 to vector<16x1xf32>
    %197 = arith.addf %193, %196 : vector<16x1xf32>
    %198 = math.rsqrt %197 : vector<16x1xf32>
    %199 = vector.broadcast %198 : vector<16x1xf32> to vector<16x32xf32>
    %200 = arith.mulf %195, %199 : vector<16x32xf32>
    %201 = vector.broadcast %16 : vector<1x32xf32> to vector<16x32xf32>
    %202 = arith.mulf %200, %201 : vector<16x32xf32>
    %203 = vector.broadcast %17 : vector<1x32xf32> to vector<16x32xf32>
    %204 = arith.addf %202, %203 : vector<16x32xf32>
    %205 = arith.truncf %204 : vector<16x32xf32> to vector<16x32xbf16>
    %cst_45 = arith.constant dense<0.000000e+00> : vector<16x64xf32>
    %206 = tpu.matmul %205, %6, %cst_45 {dimension_numbers = #tpu.dot_dimension_numbers<[1], [0], [0], [1], [0, 0, 1, 1], [], []>} : vector<16x32xbf16>, vector<32x64xbf16>, vector<16x64xf32> -> vector<16x64xf32>
    %207 = vector.broadcast %12 : vector<1x64xf32> to vector<16x64xf32>
    %208 = arith.addf %206, %207 : vector<16x64xf32>
    %cst_46 = arith.constant 0.000000e+00 : f32
    %209 = vector.broadcast %cst_46 : f32 to vector<16x64xf32>
    %210 = arith.maximumf %208, %209 : vector<16x64xf32>
    %211 = arith.truncf %210 : vector<16x64xf32> to vector<16x64xbf16>
    %cst_47 = arith.constant dense<0.000000e+00> : vector<16x32xf32>
    %212 = tpu.matmul %211, %7, %cst_47 {dimension_numbers = #tpu.dot_dimension_numbers<[1], [0], [0], [1], [0, 0, 1, 1], [], []>} : vector<16x64xbf16>, vector<64x32xbf16>, vector<16x32xf32> -> vector<16x32xf32>
    %213 = vector.broadcast %13 : vector<1x32xf32> to vector<16x32xf32>
    %214 = arith.addf %212, %213 : vector<16x32xf32>
    %215 = arith.addf %214, %204 : vector<16x32xf32>
    %cst_48 = arith.constant dense<0.000000e+00> : vector<16xf32>
    %216 = vector.multi_reduction <add>, %215, %cst_48 [1] : vector<16x32xf32> to vector<16xf32>
    %217 = vector.shape_cast %216 : vector<16xf32> to vector<16x1xf32>
    %cst_49 = arith.constant 3.200000e+01 : f32
    %218 = vector.broadcast %cst_49 : f32 to vector<16x1xf32>
    %219 = arith.divf %217, %218 : vector<16x1xf32>
    %220 = vector.broadcast %219 : vector<16x1xf32> to vector<16x32xf32>
    %221 = arith.subf %215, %220 : vector<16x32xf32>
    %222 = arith.mulf %221, %221 : vector<16x32xf32>
    %cst_50 = arith.constant dense<0.000000e+00> : vector<16xf32>
    %223 = vector.multi_reduction <add>, %222, %cst_50 [1] : vector<16x32xf32> to vector<16xf32>
    %224 = vector.shape_cast %223 : vector<16xf32> to vector<16x1xf32>
    %cst_51 = arith.constant 3.200000e+01 : f32
    %225 = vector.broadcast %cst_51 : f32 to vector<16x1xf32>
    %226 = arith.divf %224, %225 : vector<16x1xf32>
    %227 = vector.broadcast %219 : vector<16x1xf32> to vector<16x32xf32>
    %228 = arith.subf %215, %227 : vector<16x32xf32>
    %cst_52 = arith.constant 9.99999974E-6 : f32
    %229 = vector.broadcast %cst_52 : f32 to vector<16x1xf32>
    %230 = arith.addf %226, %229 : vector<16x1xf32>
    %231 = math.rsqrt %230 : vector<16x1xf32>
    %232 = vector.broadcast %231 : vector<16x1xf32> to vector<16x32xf32>
    %233 = arith.mulf %228, %232 : vector<16x32xf32>
    %234 = vector.broadcast %18 : vector<1x32xf32> to vector<16x32xf32>
    %235 = arith.mulf %233, %234 : vector<16x32xf32>
    %236 = vector.broadcast %19 : vector<1x32xf32> to vector<16x32xf32>
    %237 = arith.addf %235, %236 : vector<16x32xf32>
    %c0_53 = arith.constant 0 : index
    %c0_54 = arith.constant 0 : index
    %238 = vector.load %arg4[%c0_53, %c0_54] : memref<16x32xf32, #tpu.memory_space<vmem>>, vector<16x32xf32>
    tpu.vector_store %arg4[%c0_53, %c0_54], %237 {strides = array<i32>} : memref<16x32xf32, #tpu.memory_space<vmem>>, vector<16x32xf32>,
    return
  }
}

</mosaic_0001>

<bundles_post_ra>
// kernel: tpu_custom_call.1
= control target key start
LH: loop header
LB: loop body
LE: loop exit
PB: predicated region body
PF: predicated region fallthrough
CT: control target
= control target key end

     0   :  { %9 = vsyncpa [#allocation3], 0  ;;  %s2463_s0 = inlined_call_operand.hbm [shape: f32[16,32], index: 0, kind: input, shape index: {}]   ;;  %s2464_s1 = inlined_call_operand.hbm [shape: f32[16,32], index: 1, kind: input, shape index: {}]   ;;  %s2465_s2 = inlined_call_operand.hbm [shape: bf16[224,128], index: 2, kind: input, shape index: {}]   ;;  %s2466_s3 = inlined_call_operand.hbm [shape: f32[16,128], index: 3, kind: input, shape index: {}]   ;;  %s2467_s4 = inlined_call_operand.hbm [shape: f32[16,32], index: 4, kind: output, shape index: {}]  }
   0x1   :  { %10 = vsyncpa [#allocation6], 0 }
   0x2   :  { %11 = vsyncpa [#allocation9], 0 }
   0x3   :  { %12 = vsyncpa [#allocation4], 0  ;;  %s2072_s15 = smov [#allocation5]   ;;  %s2073_s17 = smov [#allocation2]  }
   0x4   :  { %s30_s16 = sshll.u32 %s2072_s15, 4  ;;  %s18_s18 = sshll.u32 %s2073_s17, 4  ;;  %s31_s16 = int_to_ptr.vmem [resolvable:$true] %s30_s16  ;;  %s2113_s18 = int_to_ptr.vmem [resolvable:$true] %s18_s18 }
   0x5   :  { %s1954_s21 = scalar_lea.hbm %s2464_s1, 256 }
   0x6   :  { %p1955_p0 = scmp.ne.s32.totalorder %s2464_s1, %s1954_s21  ;;  %p1958_p1 = scmp.lt.u32.totalorder %s1954_s21, %s2464_s1 }
   0x8   :  { %p1960_p2 = pnand %p1958_p1, %p1955_p0 }
   0xa   :  { %1963 = shalt.err (!%p1960_p2)
}
   0xb   :  { %s1964_s26 = scalar_lea.vmem %s31_s16, 256  ;;  %p1969_p4 = scmp.lt.s32.totalorder %s31_s16, %s31_s16 }
   0xc   :  { %p1965_p3 = scmp.ne.s32.totalorder %s31_s16, %s1964_s26  ;;  %p1970_p5 = scmp.lt.s32.totalorder %s1964_s26, %s1964_s26 }
   0xe   :  { %p1971_p6 = por %p1970_p5, %p1969_p4 }
  0x10   :  { %p1972_p7 = pnand %p1971_p6, %p1965_p3 }
  0x12   :  { %1975 = shalt.err (!%p1972_p7)
}
  0x13   :  { %s2074_s27 = smov 128   ;;  %s2075_s28 = smov 8  }
  0x14   :  { %36 = dma.hbm_to_vmem [thread:$0]  %s2464_s1, 256, %s31_s16, [#allocation6], %s2074_s27, %s2074_s27, %s2075_s28  }
  0x15   :  { %s1976_s7 = scalar_lea.hbm %s2463_s0, 256 }
  0x16   :  { %p1977_p8 = scmp.ne.s32.totalorder %s2463_s0, %s1976_s7  ;;  %p1980_p9 = scmp.lt.u32.totalorder %s1976_s7, %s2463_s0 }
  0x18   :  { %p1982_p10 = pnand %p1980_p9, %p1977_p8 }
  0x1a   :  { %1985 = shalt.err (!%p1982_p10)
}
  0x1b   :  { %s1986_s12 = scalar_lea.vmem %s2113_s18, 256  ;;  %p1991_p12 = scmp.lt.s32.totalorder %s2113_s18, %s2113_s18 }
  0x1c   :  { %p1987_p11 = scmp.ne.s32.totalorder %s2113_s18, %s1986_s12  ;;  %p1992_p13 = scmp.lt.s32.totalorder %s1986_s12, %s1986_s12 }
  0x1e   :  { %p1993_p0 = por %p1992_p13, %p1991_p12 }
  0x20   :  { %p1994_p1 = pnand %p1993_p0, %p1987_p11 }
  0x22   :  { %1997 = shalt.err (!%p1994_p1)
}
  0x23   :  { %24 = dma.hbm_to_vmem [thread:$0]  %s2463_s0, 256, %s2113_s18, [#allocation3], %s2074_s27, %s2074_s27, %s2075_s28  }
  0x24   :  { %s2076_s14 = smov [#allocation7]   ;;  %s1998_s19 = scalar_lea.hbm %s2465_s2, 1792 }
  0x25   :  { %s42_s15 = sshll.u32 %s2076_s14, 4  ;;  %p1999_p2 = scmp.ne.s32.totalorder %s2465_s2, %s1998_s19  ;;  %s43_s15 = int_to_ptr.vmem [resolvable:$true] %s42_s15 }
  0x26   :  { %p2002_p3 = scmp.lt.u32.totalorder %s1998_s19, %s2465_s2 }
  0x28   :  { %p2004_p4 = pnand %p2002_p3, %p1999_p2 }
  0x2a   :  { %2007 = shalt.err (!%p2004_p4)
}
  0x2b   :  { %s2008_s24 = scalar_lea.vmem %s43_s15, 1792  ;;  %p2013_p6 = scmp.lt.s32.totalorder %s43_s15, %s43_s15 }
  0x2c   :  { %p2009_p5 = scmp.ne.s32.totalorder %s43_s15, %s2008_s24  ;;  %p2014_p7 = scmp.lt.s32.totalorder %s2008_s24, %s2008_s24 }
  0x2e   :  { %p2015_p8 = por %p2014_p7, %p2013_p6 }
  0x30   :  { %p2016_p9 = pnand %p2015_p8, %p2009_p5 }
  0x32   :  { %2019 = shalt.err (!%p2016_p9)
}
  0x33   :  { %s2077_s0 = smov 64   ;;  %s2078_s18 = smov 4  }
  0x34   :  { %48 = dma.hbm_to_vmem [thread:$0]  %s2465_s2, 1792, %s43_s15, [#allocation6], %s2077_s0, %s2077_s0, %s2078_s18  }
  0x35   :  { %s2079_s29 = smov [#allocation8]   ;;  %s2020_s7 = scalar_lea.hbm %s2466_s3, 256 }
  0x36   :  { %s54_s30 = sshll.u32 %s2079_s29, 4  ;;  %p2021_p10 = scmp.ne.s32.totalorder %s2466_s3, %s2020_s7  ;;  %s55_s30 = int_to_ptr.vmem [resolvable:$true] %s54_s30 }
  0x37   :  { %p2024_p11 = scmp.lt.u32.totalorder %s2020_s7, %s2466_s3 }
  0x39   :  { %p2026_p12 = pnand %p2024_p11, %p2021_p10 }
  0x3b   :  { %2029 = shalt.err (!%p2026_p12)
}
  0x3c   :  { %s2030_s12 = scalar_lea.vmem %s55_s30, 256  ;;  %p2035_p0 = scmp.lt.s32.totalorder %s55_s30, %s55_s30 }
  0x3d   :  { %p2031_p13 = scmp.ne.s32.totalorder %s55_s30, %s2030_s12  ;;  %p2036_p1 = scmp.lt.s32.totalorder %s2030_s12, %s2030_s12 }
  0x3f   :  { %p2037_p2 = por %p2036_p1, %p2035_p0 }
  0x41   :  { %p2038_p3 = pnand %p2037_p2, %p2031_p13 }
  0x43   :  { %2041 = shalt.err (!%p2038_p3)
}
  0x44   :  { %60 = dma.hbm_to_vmem [thread:$0]  %s2466_s3, 256, %s55_s30, [#allocation9], %s2074_s27, %s2074_s27, %s2075_s28  }
  0x45   :  { %2064 = dma.done.wait [#allocation3], 256  }
  0x46   :  { %2065 = vsyncadd [#allocation3], 4294967040 }
  0x47   :  { %2066 = dma.done.wait [#allocation6], 2048  }
  0x48   :  { %2067 = vsyncadd [#allocation6], 4294965248 }
  0x49   :  { %2068 = dma.done.wait [#allocation9], 256  }
  0x4a   :  { %2069 = vsyncadd [#allocation9], 4294967040  ;;  %v2080_v0 = vmov 0.0   ;;  %vm2081_vm0 = vmmov 0   ;;  %v1895_v1 = vld [vmem:[#allocation7] sm:$0xff]   ;;  %v1896_v2 = vld [vmem:[#allocation7 + $0x8] sm:$0xff]   ;;  %v109_v6 = vlaneseq }
  0x4b   :  { %1723 = vmatprep.subr.bf16.mxu0 %v2080_v0  ;;  %1727 = vmatprep.mubr.msk.bf16.mxu0 %vm2081_vm0, %v2080_v0  ;;  %v2185_v3 = vld [vmem:[#allocation5] sm:$0xff]  ;;  %v2187_v4 = vld [vmem:[#allocation5 + $0x8] sm:$0xff]  ;;  %vm125_vm1 = vcmask 261120   ;;  %s2082_s3 = smov 96   ;;  %vm185_vm2 = vcmask 130048   ;;  %vm281_vm4 = vcmask 64512  }
  0x4c   :  { %1731 = vmatprep.subr.bf16.mxu1 %v2080_v0  ;;  %1733 = vmatprep.mubr.msk.bf16.mxu1 %vm2081_vm0, %v2080_v0  ;;  %v108_v5 = vpack.c.bf16 %v2187_v4, %v2185_v3  ;;  %v2196_v7 = vshrl.u32 %v109_v6, 7  ;;  %v2199_v9 = vld [vmem:[#allocation8] sm:$0xff]  ;;  %v175_v27 = vand.u32 127, %v109_v6  ;;  %v2083_v28 = vmov -1.7014117e+38   ;;  %s2084_s13 = smov 80  }
  0x4d   :  { %1724 = vmatpush3.bf16.msra.mxu0 %v1895_v1  ;;  %vm311_vm5 = vcmask 1043456   ;;  %s2085_s14 = smov 112   ;;  %s2086_s15 = smov 48   ;;  %vm1525_vm6 = vcmask 523264  }
  0x4e   :  { %1725 = vmatprep.subr.bf16.mxu0 %v2080_v0  ;;  %v111_v8 = vsub.s32 0, %v2196_v7  ;;  %vm176_vm3 = vcmp.le.s32.totalorder %v175_v27, %v2196_v7  ;;  %s2087_s16 = smov [#allocation10]  }
  0x4f   :  { %v2223_v29 = vsel %vm176_vm3, 0.0, %v2083_v28  ;;  %s1617_s17 = sshll.u32 %s2087_s16, 4  ;;  %s1618_s17 = int_to_ptr.vmem [resolvable:$true] %s1617_s17 }
  0x50   :  { %v112_v10 = vrot.slane %v2199_v9, %v111_v8  ;;  %s2042_s19 = scalar_lea.vmem %s1618_s17, 256  ;;  %p2047_p5 = scmp.lt.s32.totalorder %s1618_s17, %s1618_s17 }
  0x51   :  { %1726 = vmatpush3.bf16.msra.mxu0 %v1896_v2  ;;  %p2043_p4 = scmp.ne.s32.totalorder %s1618_s17, %s2042_s19  ;;  %p2048_p6 = scmp.lt.s32.totalorder %s2042_s19, %s2042_s19 }
  0x52   :  { %1737 = vmatprep.subr.bf16.mxu0 %v2080_v0 }
  0x53   :  { %p2049_p7 = por %p2048_p6, %p2047_p5 }
  0x54   :  { %1728 = vmatmul.mubr.msk.bf16.vlgmr.msra.gmra.mrb[0].mxu0 %vm125_vm1, %v108_v5 }
  0x55   :  { %1739 = vmatprep.mubr.msk.bf16.mxu0 %vm2081_vm0, %v2080_v0  ;;  %p2050_p8 = pnand %p2049_p7, %p2043_p4 }
 0x127   :  { %v163_v11 = vpop.f32.mrb[0].mxu0 }
 0x128   :  { %v164_v12 = vadd.f32 %v163_v11, %v112_v10  ;;  %v1729_v13 = vpop.f32.mrb[1].mxu0 }
 0x129   :  { %v166_v14 = vpop.f32.mrb[2].mxu0 }
 0x12a   :  { %v2204_v15 = vpack.c.bf16 %v164_v12, %v164_v12  ;;  %v167_v16 = vadd.f32 %v166_v14, %v112_v10  ;;  %v1730_v17 = vpop.f32.mrb[3].mxu0  ;;  %v170_v21 = vmul.f32 0.25, %v164_v12 }
 0x12c   :  { %183 = vrot.lane.b32.xlu0 %v2204_v15, %s2082_s3  ;;  %v2208_v18 = vpack.c.bf16 %v167_v16, %v167_v16  ;;  %v178_v24 = vpack.c.bf16 %v170_v21, %v170_v21  ;;  %v171_v25 = vmul.f32 0.25, %v167_v16 }
 0x12e   :  { %v179_v26 = vpack.c.bf16 %v171_v25, %v171_v25 }
 0x130   :  { %233 = vrot.lane.b32.xlu0 %v2208_v18, %s2082_s3 }
 0x19e   :  { %v184_v19 = vpop.permute.xlu0 %183 }
 0x19f   :  { %v190_v20 = vsel %vm185_vm2, %v184_v19, 0 }
 0x1a0   :  { %1732 = vmatpush3.bf16.xpose.msra.mxu1 %v190_v20 }
 0x1a1   :  { %1743 = vmatprep.subr.bf16.mxu1 %v2080_v0 }
 0x1a2   :  { %v234_v22 = vpop.permute.xlu0 %233 }
 0x1a3   :  { %v239_v23 = vsel %vm185_vm2, %v234_v22, 0 }
 0x1a4   :  { %1738 = vmatpush3.bf16.xpose.msra.mxu0 %v239_v23 }
 0x1a5   :  { %1749 = vmatprep.subr.bf16.mxu0 %v2080_v0 }
 0x1a7   :  { %1734 = vmatmul.mubr.msk.bf16.vlgmr.msra.gmra.mrb[0].mxu1 %vm185_vm2, %v178_v24 }
 0x1a8   :  { %1745 = vmatprep.mubr.msk.bf16.mxu1 %vm2081_vm0, %v2080_v0 }
 0x1ab   :  { %1740 = vmatmul.mubr.msk.bf16.vlgmr.msra.gmra.mrb[4].mxu0 %vm185_vm2, %v179_v26 }
 0x1ac   :  { %1751 = vmatprep.mubr.msk.bf16.mxu0 %vm2081_vm0, %v2080_v0 }
 0x27a   :  { %v226_v30 = vpop.f32.mrb[0].mxu1 }
 0x27b   :  { %v227_v31 = vadd.f32 %v226_v30, %v2223_v29  ;;  %v1735_v32 = vpop.f32.mrb[1].mxu1 }
 0x27c   :  { %v229_v33 = vpop.f32.mrb[2].mxu1 }
 0x27d   :  { %v1736_v34 = vpop.f32.mrb[3].mxu1  ;;  %v282_v35 = vsel %vm281_vm4, %v227_v31, -inf }
 0x27e   :  { %283 = vmax.xlane.f32.xlu1 %v282_v35  ;;  %v275_v36 = vpop.f32.mrb[4].mxu0 }
 0x27f   :  { %v276_v37 = vadd.f32 %v275_v36, %v2223_v29  ;;  %v1741_v38 = vpop.f32.mrb[5].mxu0 }
 0x280   :  { %v278_v39 = vpop.f32.mrb[6].mxu0 }
 0x281   :  { %v1742_v40 = vpop.f32.mrb[7].mxu0  ;;  %v285_v41 = vsel %vm281_vm4, %v276_v37, -inf }
 0x282   :  { %286 = vmax.xlane.f32.xlu1 %v285_v41 }
 0x293   :  { %306 = vrot.lane.b32.xlu1 %v2204_v15, %s2077_s0 }
 0x297   :  { %355 = vrot.lane.b32.xlu1 %v2208_v18, %s2077_s0 }
 0x29b   :  { %407 = vrot.lane.b32.xlu1 %v2204_v15, %s2084_s13 }
 0x30b   :  { %v284_v42 = vpop.xlane.xlu1 %283 }
 0x30c   :  { %v288_v43 = vsub.f32 %v227_v31, %v284_v42 }
 0x30e   :  { %v290_v44 = vmul.f32 1.442695, %v288_v43 }
 0x30f   :  { %v287_v45 = vpop.xlane.xlu1 %286 }
 0x310   :  { %1909 = vpow2.f32 %v290_v44  ;;  %v289_v46 = vsub.f32 %v276_v37, %v287_v45 }
 0x312   :  { %v292_v47 = vmul.f32 1.442695, %v289_v46 }
 0x313   :  { %v307_v48 = vpop.permute.xlu1 %306 }
 0x314   :  { %1911 = vpow2.f32 %v292_v47  ;;  %v313_v49 = vsel %vm311_vm5, %v307_v48, 0 }
 0x315   :  { %1744 = vmatpush3.bf16.msra.mxu1 %v313_v49 }
 0x316   :  { %1755 = vmatprep.subr.bf16.mxu1 %v2080_v0 }
 0x317   :  { %v356_v50 = vpop.permute.xlu1 %355 }
 0x318   :  { %v361_v51 = vsel %vm311_vm5, %v356_v50, 0 }
 0x319   :  { %1750 = vmatpush3.bf16.msra.mxu0 %v361_v51 }
 0x31a   :  { %v1910_v52 = vpop.eup %1909  ;;  %1761 = vmatprep.subr.bf16.mxu0 %v2080_v0 }
 0x31b   :  { %v294_v53 = vsel %vm281_vm4, %v1910_v52, 0.0  ;;  %v408_v56 = vpop.permute.xlu1 %407 }
 0x31c   :  { %295 = vadd.xlane.f32.xlu0 %v294_v53  ;;  %v413_v63 = vsel %vm185_vm2, %v408_v56, 0  ;;  %v1898_v56 = vld [vmem:[#allocation7 + $0x28] sm:$0xff]  }
 0x31e   :  { %v1912_v54 = vpop.eup %1911 }
 0x31f   :  { %v297_v55 = vsel %vm281_vm4, %v1912_v54, 0.0 }
 0x320   :  { %298 = vadd.xlane.f32.xlu1 %v297_v55  ;;  %v1897_v55 = vld [vmem:[#allocation7 + $0x20] sm:$0xff]  }
 0x331   :  { %458 = vrot.lane.b32.xlu1 %v2208_v18, %s2084_s13 }
 0x332   :  { %405 = vrot.lane.b32.xlu0 %v178_v24, %s2085_s14 }
 0x335   :  { %456 = vrot.lane.b32.xlu1 %v179_v26, %s2085_s14 }
 0x3a9   :  { %v296_v57 = vpop.xlane.xlu0 %295 }
 0x3aa   :  { %1913 = vrcp.f32 %v296_v57 }
 0x3ad   :  { %v299_v58 = vpop.xlane.xlu1 %298  ;;  %v406_v10 = vpop.permute.xlu0 %405 }
 0x3ae   :  { %1915 = vrcp.f32 %v299_v58 }
 0x3b1   :  { %v459_v2 = vpop.permute.xlu1 %458 }
 0x3b2   :  { %v464_v6 = vsel %vm185_vm2, %v459_v2, 0 }
 0x3b4   :  { %v1914_v59 = vpop.eup %1913 }
 0x3b5   :  { %v302_v60 = vmul.f32 %v1914_v59, %v1910_v52  ;;  %v457_v11 = vpop.permute.xlu1 %456 }
 0x3b7   :  { %v304_v61 = vpack.c.bf16 %v302_v60, %v302_v60 }
 0x3b8   :  { %v1916_v62 = vpop.eup %1915 }
 0x3b9   :  { %v303_v1 = vmul.f32 %v1916_v62, %v1912_v54  ;;  %1746 = vmatmul.mubr.msk.bf16.vlgmr.msra.gmra.mrb[4].mxu1 %vm281_vm4, %v304_v61 }
 0x3ba   :  { %1756 = vmatpush3.bf16.xpose.msra.mxu1 %v413_v63  ;;  %1757 = vmatprep.mubr.msk.bf16.mxu1 %vm2081_vm0, %v2080_v0 }
 0x3bb   :  { %v305_v5 = vpack.c.bf16 %v303_v1, %v303_v1  ;;  %1767 = vmatprep.subr.bf16.mxu1 %v2080_v0 }
 0x3bd   :  { %1752 = vmatmul.mubr.msk.bf16.vlgmr.msra.gmra.mrb[8].mxu0 %vm281_vm4, %v305_v5 }
 0x3be   :  { %1762 = vmatpush3.bf16.xpose.msra.mxu0 %v464_v6  ;;  %1763 = vmatprep.mubr.msk.bf16.mxu0 %vm2081_vm0, %v2080_v0 }
 0x3bf   :  { %1773 = vmatprep.subr.bf16.mxu0 %v2080_v0 }
 0x3c1   :  { %1758 = vmatmul.mubr.msk.bf16.vlgmr.msra.gmra.mrb[8].mxu1 %vm185_vm2, %v406_v10 }
 0x3c2   :  { %1769 = vmatprep.mubr.msk.bf16.mxu1 %vm2081_vm0, %v2080_v0 }
 0x3c5   :  { %1764 = vmatmul.mubr.msk.bf16.vlgmr.msra.gmra.mrb[12].mxu0 %vm185_vm2, %v457_v11 }
 0x3c6   :  { %1775 = vmatprep.mubr.msk.bf16.mxu0 %vm2081_vm0, %v2080_v0 }
 0x48c   :  { %v2261_v12 = vpop.f32.mrb[4].mxu1 }
 0x48d   :  { %v1747_v13 = vpop.f32.mrb[5].mxu1 }
 0x48e   :  { %v352_v14 = vpop.f32.mrb[6].mxu1 }
 0x48f   :  { %v1748_v16 = vpop.f32.mrb[7].mxu1 }
 0x490   :  { %v397_v17 = vpop.f32.mrb[8].mxu0 }
 0x491   :  { %v403_v19 = vpack.c.bf16 %v397_v17, %v2261_v12  ;;  %v1753_v20 = vpop.f32.mrb[9].mxu0  ;;  %v729_v12 = vsub.s32 2, %v2196_v7 }
 0x492   :  { %v400_v21 = vpop.f32.mrb[10].mxu0 }
 0x493   :  { %v1754_v22 = vpop.f32.mrb[11].mxu0  ;;  %v730_v13 = vrot.slane %v2199_v9, %v729_v12 }
 0x494   :  { %v449_v23 = vpop.f32.mrb[8].mxu1 }
 0x495   :  { %v450_v24 = vadd.f32 %v449_v23, %v2223_v29  ;;  %v1759_v25 = vpop.f32.mrb[9].mxu1 }
 0x496   :  { %v452_v26 = vpop.f32.mrb[10].mxu1 }
 0x497   :  { %v1760_v27 = vpop.f32.mrb[11].mxu1  ;;  %v506_v28 = vsel %vm281_vm4, %v450_v24, -inf }
 0x498   :  { %507 = vmax.xlane.f32.xlu1 %v506_v28  ;;  %v500_v30 = vpop.f32.mrb[12].mxu0 }
 0x499   :  { %v501_v31 = vadd.f32 %v500_v30, %v2223_v29  ;;  %v1765_v32 = vpop.f32.mrb[13].mxu0 }
 0x49a   :  { %v503_v33 = vpop.f32.mrb[14].mxu0 }
 0x49b   :  { %v1766_v34 = vpop.f32.mrb[15].mxu0  ;;  %v509_v35 = vsel %vm281_vm4, %v501_v31, -inf }
 0x49c   :  { %510 = vmax.xlane.f32.xlu0 %v509_v35 }
 0x4b2   :  { %578 = vrot.lane.b32.xlu0 %v2208_v18, %s2086_s15 }
 0x525   :  { %v508_v36 = vpop.xlane.xlu1 %507 }
 0x526   :  { %v512_v37 = vsub.f32 %v450_v24, %v508_v36 }
 0x528   :  { %v514_v38 = vmul.f32 1.442695, %v512_v37 }
 0x529   :  { %v511_v39 = vpop.xlane.xlu0 %510 }
 0x52a   :  { %1917 = vpow2.f32 %v514_v38  ;;  %v513_v40 = vsub.f32 %v501_v31, %v511_v39  ;;  %v1899_v38 = vld [vmem:[#allocation7 + $0x10] sm:$0xff]  }
 0x52c   :  { %v516_v41 = vmul.f32 1.442695, %v513_v40 }
 0x52d   :  { %v579_v42 = vpop.permute.xlu0 %578 }
 0x52e   :  { %1919 = vpow2.f32 %v516_v41  ;;  %v584_v29 = vsel %vm311_vm5, %v579_v42, 0 }
 0x52f   :  { %1774 = vmatpush3.bf16.msra.mxu0 %v584_v29 }
 0x530   :  { %1785 = vmatprep.subr.bf16.mxu0 %v2080_v0 }
 0x534   :  { %v1918_v43 = vpop.eup %1917 }
 0x535   :  { %v518_v44 = vsel %vm281_vm4, %v1918_v43, 0.0 }
 0x536   :  { %519 = vadd.xlane.f32.xlu1 %v518_v44  ;;  %v764_v44 = vsub.s32 6, %v2196_v7 }
 0x538   :  { %v1920_v45 = vpop.eup %1919 }
 0x539   :  { %v521_v18 = vsel %vm281_vm4, %v1920_v45, 0.0 }
 0x53a   :  { %522 = vadd.xlane.f32.xlu1 %v521_v18  ;;  %v765_v18 = vrot.slane %v2199_v9, %v764_v44 }
 0x54b   :  { %530 = vrot.lane.b32.xlu1 %v2204_v15, %s2086_s15 }
 0x5c3   :  { %v520_v46 = vpop.xlane.xlu1 %519 }
 0x5c4   :  { %1921 = vrcp.f32 %v520_v46 }
 0x5c7   :  { %v523_v47 = vpop.xlane.xlu1 %522 }
 0x5c8   :  { %1923 = vrcp.f32 %v523_v47 }
 0x5cb   :  { %v531_v48 = vpop.permute.xlu1 %530 }
 0x5cc   :  { %v536_v49 = vsel %vm311_vm5, %v531_v48, 0 }
 0x5cd   :  { %1768 = vmatpush3.bf16.msra.mxu1 %v536_v49 }
 0x5ce   :  { %v1922_v50 = vpop.eup %1921  ;;  %1779 = vmatprep.subr.bf16.mxu1 %v2080_v0 }
 0x5cf   :  { %v526_v51 = vmul.f32 %v1922_v50, %v1918_v43 }
 0x5d1   :  { %v528_v52 = vpack.c.bf16 %v526_v51, %v526_v51 }
 0x5d2   :  { %v1924_v53 = vpop.eup %1923 }
 0x5d3   :  { %v527_v54 = vmul.f32 %v1924_v53, %v1920_v45  ;;  %1770 = vmatmul.mubr.msk.bf16.vlgmr.msra.gmra.mrb[12].mxu1 %vm281_vm4, %v528_v52  ;;  %v770_v45 = vsub.s32 7, %v2196_v7 }
 0x5d4   :  { %1781 = vmatprep.mubr.msk.bf16.mxu1 %vm2081_vm0, %v2080_v0  ;;  %1780 = vmatpush3.bf16.msra.mxu1 %v1898_v56 }
 0x5d5   :  { %v529_v15 = vpack.c.bf16 %v527_v54, %v527_v54  ;;  %1791 = vmatprep.subr.bf16.mxu1 %v2080_v0  ;;  %v771_v48 = vrot.slane %v2199_v9, %v770_v45  ;;  %v2310_v54 = vld [vmem:[#allocation2] sm:$0xff] }
 0x5d7   :  { %1776 = vmatmul.mubr.msk.bf16.vlgmr.msra.gmra.mrb[16].mxu0 %vm281_vm4, %v529_v15 }
 0x5d8   :  { %1786 = vmatpush3.bf16.msra.mxu0 %v1897_v55  ;;  %1787 = vmatprep.mubr.msk.bf16.mxu0 %vm2081_vm0, %v2080_v0  ;;  %v2312_v55 = vld [vmem:[#allocation2 + $0x8] sm:$0xff] }
 0x5d9   :  { %1799 = vmatprep.subr.bf16.mxu0 %v2080_v0 }
 0x5df   :  { %1788 = vmatmul.mubr.msk.bf16.vlgmr.msra.gmra.mrb[20].mxu0 %vm185_vm2, %v403_v19 }
 0x5e0   :  { %1801 = vmatprep.mubr.msk.bf16.mxu0 %vm2081_vm0, %v2080_v0 }
 0x6a6   :  { %v572_v57 = vpop.f32.mrb[12].mxu1 }
 0x6a7   :  { %v1771_v58 = vpop.f32.mrb[13].mxu1 }
 0x6a8   :  { %v575_v59 = vpop.f32.mrb[14].mxu1 }
 0x6a9   :  { %v1772_v60 = vpop.f32.mrb[15].mxu1  ;;  %v779_v59 = vsub.s32 1, %v2196_v7 }
 0x6aa   :  { %v620_v61 = vpop.f32.mrb[16].mxu0 }
 0x6ab   :  { %v626_v62 = vpack.c.bf16 %v620_v61, %v572_v57  ;;  %v1777_v63 = vpop.f32.mrb[17].mxu0  ;;  %v780_v60 = vrot.slane %v2199_v9, %v779_v59 }
 0x6ac   :  { %v623_v1 = vpop.f32.mrb[18].mxu0 }
 0x6ad   :  { %v1778_v2 = vpop.f32.mrb[19].mxu0  ;;  %1782 = vmatmul.mubr.msk.bf16.vlgmr.msra.gmra.mrb[16].mxu1 %vm185_vm2, %v626_v62 }
 0x6ae   :  { %1795 = vmatprep.mubr.msk.bf16.mxu1 %vm2081_vm0, %v2080_v0  ;;  %1792 = vmatpush3.bf16.msra.mxu1 %v1899_v38 }
 0x6af   :  { %1793 = vmatprep.subr.bf16.mxu1 %v2080_v0 }
 0x6b2   :  { %v720_v5 = vpop.f32.mrb[20].mxu0 }
 0x6b3   :  { %v1789_v6 = vpop.f32.mrb[21].mxu0 }
 0x6b4   :  { %v723_v10 = vpop.f32.mrb[22].mxu0 }
 0x6b5   :  { %v1790_v11 = vpop.f32.mrb[23].mxu0 }
 0x780   :  { %v670_v14 = vpop.f32.mrb[16].mxu1 }
 0x781   :  { %v721_v16 = vadd.f32 %v720_v5, %v670_v14  ;;  %v1783_v17 = vpop.f32.mrb[17].mxu1 }
 0x782   :  { %v673_v19 = vpop.f32.mrb[18].mxu1 }
 0x783   :  { %v731_v20 = vadd.f32 %v730_v13, %v721_v16  ;;  %v724_v21 = vadd.f32 %v723_v10, %v673_v19  ;;  %v1784_v22 = vpop.f32.mrb[19].mxu1 }
 0x785   :  { %v732_v23 = vadd.f32 %v730_v13, %v724_v21  ;;  %v733_v24 = vadd.f32 %v731_v20, %v2185_v3 }
 0x787   :  { %v735_v25 = vsel %vm125_vm1, %v733_v24, 0.0  ;;  %v734_v26 = vadd.f32 %v732_v23, %v2187_v4  ;;  %v1900_v4 = vld [vmem:[#allocation7 + $0x18] sm:$0xff]  }
 0x788   :  { %736 = vadd.xlane.f32.xlu1 %v735_v25  ;;  %1794 = vmatpush3.bf16.msra.mxu1 %v1900_v4 }
 0x789   :  { %v738_v27 = vsel %vm125_vm1, %v734_v26, 0.0  ;;  %1805 = vmatprep.subr.bf16.mxu1 %v2080_v0 }
 0x78a   :  { %739 = vadd.xlane.f32.xlu0 %v738_v27 }
 0x815   :  { %v737_v28 = vpop.xlane.xlu1 %736 }
 0x816   :  { %v742_v30 = vmul.f32 0.03125, %v737_v28 }
 0x817   :  { %v740_v31 = vpop.xlane.xlu0 %739 }
 0x818   :  { %v744_v32 = vsub.f32 %v733_v24, %v742_v30  ;;  %v743_v33 = vmul.f32 0.03125, %v740_v31 }
 0x81a   :  { %v745_v34 = vsub.f32 %v734_v26, %v743_v33  ;;  %v746_v35 = vmul.f32 %v744_v32, %v744_v32 }
 0x81c   :  { %v748_v36 = vsel %vm125_vm1, %v746_v35, 0.0  ;;  %v747_v37 = vmul.f32 %v745_v34, %v745_v34 }
 0x81d   :  { %749 = vadd.xlane.f32.xlu1 %v748_v36 }
 0x81e   :  { %v751_v3 = vsel %vm125_vm1, %v747_v37, 0.0 }
 0x81f   :  { %752 = vadd.xlane.f32.xlu0 %v751_v3 }
 0x8aa   :  { %v750_v39 = vpop.xlane.xlu1 %749 }
 0x8ab   :  { %v754_v40 = vmul.f32 0.03125, %v750_v39 }
 0x8ac   :  { %v753_v41 = vpop.xlane.xlu0 %752 }
 0x8ad   :  { %v756_v42 = vadd.f32 1e-05, %v754_v40  ;;  %v755_v29 = vmul.f32 0.03125, %v753_v41 }
 0x8af   :  { %1925 = vrsqrt.f32 %v756_v42  ;;  %v757_v43 = vadd.f32 1e-05, %v755_v29 }
 0x8b1   :  { %1927 = vrsqrt.f32 %v757_v43 }
 0x8b9   :  { %v1926_v46 = vpop.eup %1925 }
 0x8ba   :  { %v760_v47 = vmul.f32 %v1926_v46, %v744_v32 }
 0x8bb   :  { %v1928_v49 = vpop.eup %1927 }
 0x8bc   :  { %v766_v50 = vmul.f32 %v765_v18, %v760_v47  ;;  %v761_v51 = vmul.f32 %v1928_v49, %v745_v34 }
 0x8be   :  { %v767_v52 = vmul.f32 %v765_v18, %v761_v51  ;;  %v2308_v53 = vadd.f32 %v771_v48, %v766_v50 }
 0x8c0   :  { %v2314_v15 = vadd.f32 %v771_v48, %v767_v52  ;;  %v774_v56 = vadd.f32 %v2308_v53, %v2310_v54 }
 0x8c2   :  { %v775_v57 = vadd.f32 %v2314_v15, %v2312_v55 }
 0x8c4   :  { %v776_v58 = vpack.c.bf16 %v775_v57, %v774_v56 }
 0x8c6   :  { %1796 = vmatmul.mubr.msk.bf16.vlgmr.msra.gmra.mrb[20].mxu1 %vm125_vm1, %v776_v58 }
 0x8c7   :  { %1807 = vmatprep.mubr.msk.bf16.mxu1 %vm2081_vm0, %v2080_v0 }
 0x999   :  { %v830_v61 = vpop.f32.mrb[20].mxu1 }
 0x99a   :  { %v831_v62 = vadd.f32 %v830_v61, %v780_v60  ;;  %v1797_v63 = vpop.f32.mrb[21].mxu1 }
 0x99b   :  { %v833_v1 = vpop.f32.mrb[22].mxu1 }
 0x99c   :  { %v2327_v2 = vpack.c.bf16 %v831_v62, %v831_v62  ;;  %v834_v5 = vadd.f32 %v833_v1, %v780_v60  ;;  %v1798_v6 = vpop.f32.mrb[23].mxu1  ;;  %v837_v16 = vmul.f32 0.25, %v831_v62 }
 0x99e   :  { %v2329_v10 = vpack.c.bf16 %v834_v5, %v834_v5  ;;  %844 = vrot.lane.b32.xlu1 %v2327_v2, %s2082_s3  ;;  %v838_v19 = vmul.f32 0.25, %v834_v5  ;;  %v839_v20 = vpack.c.bf16 %v837_v16, %v837_v16 }
 0x9a0   :  { %893 = vrot.lane.b32.xlu0 %v2329_v10, %s2082_s3  ;;  %v840_v21 = vpack.c.bf16 %v838_v19, %v838_v19 }
 0xa10   :  { %v845_v11 = vpop.permute.xlu1 %844 }
 0xa11   :  { %v850_v13 = vsel %vm185_vm2, %v845_v11, 0 }
 0xa12   :  { %1800 = vmatpush3.bf16.xpose.msra.mxu0 %v850_v13  ;;  %v894_v14 = vpop.permute.xlu0 %893 }
 0xa13   :  { %v899_v17 = vsel %vm185_vm2, %v894_v14, 0  ;;  %1811 = vmatprep.subr.bf16.mxu0 %v2080_v0 }
 0xa14   :  { %1806 = vmatpush3.bf16.xpose.msra.mxu1 %v899_v17 }
 0xa15   :  { %1817 = vmatprep.subr.bf16.mxu1 %v2080_v0 }
 0xa19   :  { %1802 = vmatmul.mubr.msk.bf16.vlgmr.msra.gmra.mrb[24].mxu0 %vm185_vm2, %v839_v20 }
 0xa1a   :  { %1813 = vmatprep.mubr.msk.bf16.mxu0 %vm2081_vm0, %v2080_v0 }
 0xa1b   :  { %1808 = vmatmul.mubr.msk.bf16.vlgmr.msra.gmra.mrb[24].mxu1 %vm185_vm2, %v840_v21 }
 0xa1c   :  { %1819 = vmatprep.mubr.msk.bf16.mxu1 %vm2081_vm0, %v2080_v0 }
 0xaec   :  { %v886_v22 = vpop.f32.mrb[24].mxu0 }
 0xaed   :  { %v1803_v23 = vpop.f32.mrb[25].mxu0  ;;  %v941_v24 = vsel %vm281_vm4, %v886_v22, -inf }
 0xaee   :  { %v935_v25 = vpop.f32.mrb[24].mxu1  ;;  %942 = vmax.xlane.f32.xlu1 %v941_v24  ;;  %v889_v26 = vpop.f32.mrb[26].mxu0 }
 0xaef   :  { %v1804_v27 = vpop.f32.mrb[27].mxu0  ;;  %v1809_v28 = vpop.f32.mrb[25].mxu1  ;;  %v944_v30 = vsel %vm281_vm4, %v935_v25, -inf }
 0xaf0   :  { %945 = vmax.xlane.f32.xlu0 %v944_v30  ;;  %v938_v31 = vpop.f32.mrb[26].mxu1 }
 0xaf1   :  { %v1810_v32 = vpop.f32.mrb[27].mxu1 }
 0xaff   :  { %965 = vrot.lane.b32.xlu1 %v2327_v2, %s2077_s0 }
 0xb7b   :  { %v943_v33 = vpop.xlane.xlu1 %942 }
 0xb7c   :  { %v947_v34 = vsub.f32 %v886_v22, %v943_v33 }
 0xb7d   :  { %v946_v35 = vpop.xlane.xlu0 %945 }
 0xb7e   :  { %v949_v36 = vmul.f32 1.442695, %v947_v34  ;;  %v948_v37 = vsub.f32 %v935_v25, %v946_v35 }
 0xb7f   :  { %v966_v3 = vpop.permute.xlu1 %965 }
 0xb80   :  { %1929 = vpow2.f32 %v949_v36  ;;  %v951_v38 = vmul.f32 1.442695, %v948_v37  ;;  %v971_v4 = vsel %vm311_vm5, %v966_v3, 0 }
 0xb81   :  { %1812 = vmatpush3.bf16.msra.mxu0 %v971_v4 }
 0xb82   :  { %1931 = vpow2.f32 %v951_v38  ;;  %1823 = vmatprep.subr.bf16.mxu0 %v2080_v0 }
 0xb8a   :  { %v1930_v39 = vpop.eup %1929 }
 0xb8b   :  { %v953_v40 = vsel %vm281_vm4, %v1930_v39, 0.0 }
 0xb8c   :  { %v1932_v41 = vpop.eup %1931  ;;  %954 = vadd.xlane.f32.xlu1 %v953_v40 }
 0xb8d   :  { %v956_v42 = vsel %vm281_vm4, %v1932_v41, 0.0 }
 0xb8e   :  { %957 = vadd.xlane.f32.xlu0 %v956_v42 }
 0xb9d   :  { %1065 = vrot.lane.b32.xlu1 %v2327_v2, %s2084_s13 }
 0xba1   :  { %1116 = vrot.lane.b32.xlu1 %v2329_v10, %s2084_s13 }
 0xba4   :  { %1013 = vrot.lane.b32.xlu0 %v2329_v10, %s2077_s0 }
 0xba5   :  { %1114 = vrot.lane.b32.xlu1 %v840_v21, %s2085_s14 }
 0xba8   :  { %1063 = vrot.lane.b32.xlu0 %v839_v20, %s2085_s14 }
 0xc19   :  { %v955_v29 = vpop.xlane.xlu1 %954 }
 0xc1a   :  { %1933 = vrcp.f32 %v955_v29 }
 0xc1b   :  { %v958_v43 = vpop.xlane.xlu0 %957 }
 0xc1c   :  { %1935 = vrcp.f32 %v958_v43 }
 0xc1d   :  { %v1066_v18 = vpop.permute.xlu1 %1065 }
 0xc1e   :  { %v1071_v52 = vsel %vm185_vm2, %v1066_v18, 0  ;;  %v1902_v18 = vld [vmem:[#allocation7 + $0x38] sm:$0xff]  }
 0xc1f   :  { %v1014_v44 = vpop.permute.xlu0 %1013 }
 0xc20   :  { %v1019_v45 = vsel %vm311_vm5, %v1014_v44, 0 }
 0xc21   :  { %1818 = vmatpush3.bf16.msra.mxu1 %v1019_v45  ;;  %v1117_v51 = vpop.permute.xlu1 %1116  ;;  %v1901_v45 = vld [vmem:[#allocation7 + $0x30] sm:$0xff]  }
 0xc22   :  { %1829 = vmatprep.subr.bf16.mxu1 %v2080_v0  ;;  %v1122_v57 = vsel %vm185_vm2, %v1117_v51, 0 }
 0xc23   :  { %v1064_v58 = vpop.permute.xlu0 %1063 }
 0xc24   :  { %v1934_v46 = vpop.eup %1933 }
 0xc25   :  { %v961_v47 = vmul.f32 %v1934_v46, %v1930_v39  ;;  %v1115_v60 = vpop.permute.xlu1 %1114 }
 0xc26   :  { %v1936_v48 = vpop.eup %1935 }
 0xc27   :  { %v962_v49 = vmul.f32 %v1936_v48, %v1932_v41  ;;  %v963_v50 = vpack.c.bf16 %v961_v47, %v961_v47 }
 0xc29   :  { %1814 = vmatmul.mubr.msk.bf16.vlgmr.msra.gmra.mrb[28].mxu0 %vm281_vm4, %v963_v50  ;;  %v964_v56 = vpack.c.bf16 %v962_v49, %v962_v49 }
 0xc2a   :  { %1824 = vmatpush3.bf16.xpose.msra.mxu0 %v1071_v52  ;;  %1825 = vmatprep.mubr.msk.bf16.mxu0 %vm2081_vm0, %v2080_v0 }
 0xc2b   :  { %1820 = vmatmul.mubr.msk.bf16.vlgmr.msra.gmra.mrb[28].mxu1 %vm281_vm4, %v964_v56  ;;  %1835 = vmatprep.subr.bf16.mxu0 %v2080_v0 }
 0xc2c   :  { %1830 = vmatpush3.bf16.xpose.msra.mxu1 %v1122_v57  ;;  %1831 = vmatprep.mubr.msk.bf16.mxu1 %vm2081_vm0, %v2080_v0 }
 0xc2d   :  { %1841 = vmatprep.subr.bf16.mxu1 %v2080_v0 }
 0xc31   :  { %1826 = vmatmul.mubr.msk.bf16.vlgmr.msra.gmra.mrb[32].mxu0 %vm185_vm2, %v1064_v58 }
 0xc32   :  { %1837 = vmatprep.mubr.msk.bf16.mxu0 %vm2081_vm0, %v2080_v0 }
 0xc33   :  { %1832 = vmatmul.mubr.msk.bf16.vlgmr.msra.gmra.mrb[32].mxu1 %vm185_vm2, %v1115_v60 }
 0xc34   :  { %1843 = vmatprep.mubr.msk.bf16.mxu1 %vm2081_vm0, %v2080_v0 }
 0xcfc   :  { %v2379_v61 = vpop.f32.mrb[28].mxu0 }
 0xcfd   :  { %v1815_v62 = vpop.f32.mrb[29].mxu0 }
 0xcfe   :  { %v1010_v63 = vpop.f32.mrb[30].mxu0  ;;  %v1055_v1 = vpop.f32.mrb[28].mxu1 }
 0xcff   :  { %v1061_v5 = vpack.c.bf16 %v1055_v1, %v2379_v61  ;;  %v1816_v6 = vpop.f32.mrb[31].mxu0  ;;  %v1821_v11 = vpop.f32.mrb[29].mxu1  ;;  %v1387_v63 = vsub.s32 3, %v2196_v7 }
 0xd00   :  { %v1058_v13 = vpop.f32.mrb[30].mxu1 }
 0xd01   :  { %v1822_v14 = vpop.f32.mrb[31].mxu1  ;;  %v1388_v1 = vrot.slane %v2199_v9, %v1387_v63 }
 0xd04   :  { %v1107_v16 = vpop.f32.mrb[32].mxu0 }
 0xd05   :  { %v1827_v17 = vpop.f32.mrb[33].mxu0  ;;  %v1164_v19 = vsel %vm281_vm4, %v1107_v16, -inf }
 0xd06   :  { %v1158_v20 = vpop.f32.mrb[32].mxu1  ;;  %1165 = vmax.xlane.f32.xlu0 %v1164_v19  ;;  %v1110_v21 = vpop.f32.mrb[34].mxu0 }
 0xd07   :  { %v1828_v22 = vpop.f32.mrb[35].mxu0  ;;  %v1833_v23 = vpop.f32.mrb[33].mxu1  ;;  %v1167_v24 = vsel %vm281_vm4, %v1158_v20, -inf }
 0xd08   :  { %1168 = vmax.xlane.f32.xlu1 %v1167_v24  ;;  %v1161_v25 = vpop.f32.mrb[34].mxu1 }
 0xd09   :  { %v1834_v26 = vpop.f32.mrb[35].mxu1 }
 0xd19   :  { %1188 = vrot.lane.b32.xlu1 %v2327_v2, %s2086_s15 }
 0xd93   :  { %v1166_v27 = vpop.xlane.xlu0 %1165 }
 0xd94   :  { %v1170_v28 = vsub.f32 %v1107_v16, %v1166_v27 }
 0xd95   :  { %v1169_v30 = vpop.xlane.xlu1 %1168 }
 0xd96   :  { %v1172_v31 = vmul.f32 1.442695, %v1170_v28  ;;  %v1171_v32 = vsub.f32 %v1158_v20, %v1169_v30 }
 0xd98   :  { %1937 = vpow2.f32 %v1172_v31  ;;  %v1174_v33 = vmul.f32 1.442695, %v1171_v32 }
 0xd99   :  { %v1189_v34 = vpop.permute.xlu1 %1188 }
 0xd9a   :  { %1939 = vpow2.f32 %v1174_v33  ;;  %v1194_v35 = vsel %vm311_vm5, %v1189_v34, 0  ;;  %v1903_v34 = vld [vmem:[#allocation7 + $0x40] sm:$0xff]  }
 0xd9b   :  { %1836 = vmatpush3.bf16.msra.mxu0 %v1194_v35  ;;  %v1905_v35 = vld [vmem:[#allocation7 + $0x50] sm:$0xff]  }
 0xd9c   :  { %1847 = vmatprep.subr.bf16.mxu0 %v2080_v0 }
 0xda2   :  { %v1938_v36 = vpop.eup %1937 }
 0xda3   :  { %v1176_v37 = vsel %vm281_vm4, %v1938_v36, 0.0 }
 0xda4   :  { %v1940_v3 = vpop.eup %1939  ;;  %1177 = vadd.xlane.f32.xlu0 %v1176_v37 }
 0xda5   :  { %v1179_v2 = vsel %vm281_vm4, %v1940_v3, 0.0 }
 0xda8   :  { %1180 = vadd.xlane.f32.xlu0 %v1179_v2 }
 0xdbe   :  { %1236 = vrot.lane.b32.xlu0 %v2329_v10, %s2086_s15 }
 0xe31   :  { %v1178_v38 = vpop.xlane.xlu0 %1177 }
 0xe32   :  { %1941 = vrcp.f32 %v1178_v38 }
 0xe35   :  { %v1181_v4 = vpop.xlane.xlu0 %1180 }
 0xe36   :  { %1943 = vrcp.f32 %v1181_v4 }
 0xe39   :  { %v1237_v39 = vpop.permute.xlu0 %1236 }
 0xe3a   :  { %v1242_v40 = vsel %vm311_vm5, %v1237_v39, 0 }
 0xe3b   :  { %1842 = vmatpush3.bf16.msra.mxu1 %v1242_v40  ;;  %v2423_v40 = vld [vmem:[#allocation8 + $0x8] sm:$0xff] }
 0xe3c   :  { %v1942_v41 = vpop.eup %1941  ;;  %1853 = vmatprep.subr.bf16.mxu1 %v2080_v0 }
 0xe3d   :  { %v1184_v42 = vmul.f32 %v1942_v41, %v1938_v36  ;;  %v1906_v36 = vld [vmem:[#allocation7 + $0x58] sm:$0xff]   ;;  %v1424_v41 = vrot.slane %v2423_v40, %v111_v8  ;;  %v1908_v8 = vld [vmem:[#allocation7 + $0x68] sm:$0xff]  }
 0xe3f   :  { %v1186_v29 = vpack.c.bf16 %v1184_v42, %v1184_v42 }
 0xe40   :  { %v1944_v43 = vpop.eup %1943 }
 0xe41   :  { %v1185_v44 = vmul.f32 %v1944_v43, %v1940_v3  ;;  %1838 = vmatmul.mubr.msk.bf16.vlgmr.msra.gmra.mrb[36].mxu0 %vm281_vm4, %v1186_v29 }
 0xe42   :  { %1849 = vmatprep.mubr.msk.bf16.mxu0 %vm2081_vm0, %v2080_v0  ;;  %1848 = vmatpush3.bf16.msra.mxu0 %v1902_v18 }
 0xe43   :  { %v1187_v10 = vpack.c.bf16 %v1185_v44, %v1185_v44  ;;  %1859 = vmatprep.subr.bf16.mxu0 %v2080_v0  ;;  %v1430_v44 = vrot.slane %v2423_v40, %v779_v59 }
 0xe45   :  { %1844 = vmatmul.mubr.msk.bf16.vlgmr.msra.gmra.mrb[36].mxu1 %vm281_vm4, %v1187_v10 }
 0xe46   :  { %1854 = vmatpush3.bf16.msra.mxu1 %v1901_v45  ;;  %1855 = vmatprep.mubr.msk.bf16.mxu1 %vm2081_vm0, %v2080_v0 }
 0xe47   :  { %1867 = vmatprep.subr.bf16.mxu1 %v2080_v0 }
 0xe4d   :  { %1856 = vmatmul.mubr.msk.bf16.vlgmr.msra.gmra.mrb[40].mxu1 %vm185_vm2, %v1061_v5 }
 0xe4e   :  { %1875 = vmatprep.mubr.msk.bf16.mxu1 %vm2081_vm0, %v2080_v0  ;;  %1868 = vmatpush3.bf16.msra.mxu1 %v1905_v35 }
 0xe4f   :  { %1869 = vmatprep.subr.bf16.mxu1 %v2080_v0 }
 0xe52   :  { %1870 = vmatpush3.bf16.msra.mxu1 %v1906_v36  ;;  %v1601_v36 = vrot.slane %v2423_v40, %v729_v12 }
 0xe53   :  { %1871 = vmatprep.subr.bf16.mxu1 %v2080_v0 }
 0xf14   :  { %v1230_v46 = vpop.f32.mrb[36].mxu0 }
 0xf15   :  { %v1839_v47 = vpop.f32.mrb[37].mxu0 }
 0xf16   :  { %v1233_v48 = vpop.f32.mrb[38].mxu0 }
 0xf17   :  { %v1840_v49 = vpop.f32.mrb[39].mxu0 }
 0xf18   :  { %v1278_v50 = vpop.f32.mrb[36].mxu1  ;;  %v1907_v49 = vld [vmem:[#allocation7 + $0x60] sm:$0xff]  }
 0xf19   :  { %v1284_v51 = vpack.c.bf16 %v1278_v50, %v1230_v46  ;;  %v1845_v52 = vpop.f32.mrb[37].mxu1  ;;  %1872 = vmatpush3.bf16.msra.mxu1 %v1907_v49  ;;  %v1436_v50 = vsub.s32 4, %v2196_v7 }
 0xf1a   :  { %v1281_v56 = vpop.f32.mrb[38].mxu1  ;;  %1873 = vmatprep.subr.bf16.mxu1 %v2080_v0 }
 0xf1b   :  { %v1846_v57 = vpop.f32.mrb[39].mxu1  ;;  %1850 = vmatmul.mubr.msk.bf16.vlgmr.msra.gmra.mrb[40].mxu0 %vm185_vm2, %v1284_v51  ;;  %v1437_v51 = vrot.slane %v2199_v9, %v1436_v50 }
 0xf1c   :  { %1863 = vmatprep.mubr.msk.bf16.mxu0 %vm2081_vm0, %v2080_v0  ;;  %1860 = vmatpush3.bf16.msra.mxu0 %v1903_v34 }
 0xf1d   :  { %1861 = vmatprep.subr.bf16.mxu0 %v2080_v0  ;;  %1874 = vmatpush3.bf16.msra.mxu1 %v1908_v8  ;;  %v1953_v0 = vld [vmem:[#allocation8] sm:$0xff] }
 0xf20   :  { %v1378_v58 = vpop.f32.mrb[40].mxu1 }
 0xf21   :  { %v1857_v60 = vpop.f32.mrb[41].mxu1 }
 0xf22   :  { %v1381_v61 = vpop.f32.mrb[42].mxu1 }
 0xf23   :  { %v1858_v62 = vpop.f32.mrb[43].mxu1 }
 0xfee   :  { %v1328_v5 = vpop.f32.mrb[40].mxu0 }
 0xfef   :  { %v1379_v6 = vadd.f32 %v1378_v58, %v1328_v5  ;;  %v1851_v11 = vpop.f32.mrb[41].mxu0  ;;  %v1499_v5 = vsub.s32 5, %v2196_v7 }
 0xff0   :  { %v1331_v13 = vpop.f32.mrb[42].mxu0 }
 0xff1   :  { %v1389_v14 = vadd.f32 %v1388_v1, %v1379_v6  ;;  %v1382_v16 = vadd.f32 %v1381_v61, %v1331_v13  ;;  %v1852_v17 = vpop.f32.mrb[43].mxu0  ;;  %v1500_v6 = vrot.slane %v1953_v0, %v1499_v5 }
 0xff3   :  { %v1390_v19 = vadd.f32 %v1388_v1, %v1382_v16  ;;  %v1391_v20 = vadd.f32 %v1389_v14, %v2308_v53 }
 0xff5   :  { %v1393_v21 = vadd.f32 %v1391_v20, %v2310_v54  ;;  %v1392_v22 = vadd.f32 %v1390_v19, %v2314_v15 }
 0xff7   :  { %v1395_v23 = vsel %vm125_vm1, %v1393_v21, 0.0  ;;  %v1394_v24 = vadd.f32 %v1392_v22, %v2312_v55  ;;  %v1904_v55 = vld [vmem:[#allocation7 + $0x48] sm:$0xff]  }
 0xff8   :  { %1396 = vadd.xlane.f32.xlu1 %v1395_v23  ;;  %1862 = vmatpush3.bf16.msra.mxu0 %v1904_v55 }
 0xff9   :  { %v1398_v25 = vsel %vm125_vm1, %v1394_v24, 0.0 }
 0xffa   :  { %1399 = vadd.xlane.f32.xlu0 %v1398_v25 }
0x1085   :  { %v1397_v26 = vpop.xlane.xlu1 %1396 }
0x1086   :  { %v1401_v27 = vmul.f32 0.03125, %v1397_v26 }
0x1087   :  { %v1400_v28 = vpop.xlane.xlu0 %1399 }
0x1088   :  { %v1403_v30 = vsub.f32 %v1393_v21, %v1401_v27  ;;  %v1402_v31 = vmul.f32 0.03125, %v1400_v28 }
0x108a   :  { %v1404_v32 = vsub.f32 %v1394_v24, %v1402_v31  ;;  %v1405_v33 = vmul.f32 %v1403_v30, %v1403_v30 }
0x108c   :  { %v1407_v53 = vsel %vm125_vm1, %v1405_v33, 0.0  ;;  %v1406_v54 = vmul.f32 %v1404_v32, %v1404_v32 }
0x108d   :  { %1408 = vadd.xlane.f32.xlu1 %v1407_v53 }
0x108e   :  { %v1410_v15 = vsel %vm125_vm1, %v1406_v54, 0.0 }
0x108f   :  { %1411 = vadd.xlane.f32.xlu0 %v1410_v15 }
0x111a   :  { %v1409_v37 = vpop.xlane.xlu1 %1408 }
0x111b   :  { %v1413_v3 = vmul.f32 0.03125, %v1409_v37 }
0x111c   :  { %v1412_v2 = vpop.xlane.xlu0 %1411 }
0x111d   :  { %v1415_v38 = vadd.f32 1e-05, %v1413_v3  ;;  %v1414_v4 = vmul.f32 0.03125, %v1412_v2  ;;  %v1607_v3 = vrot.slane %v2423_v40, %v1387_v63 }
0x111f   :  { %1945 = vrsqrt.f32 %v1415_v38  ;;  %v1416_v39 = vadd.f32 1e-05, %v1414_v4 }
0x1121   :  { %1947 = vrsqrt.f32 %v1416_v39 }
0x1129   :  { %v1946_v42 = vpop.eup %1945 }
0x112a   :  { %v1419_v29 = vmul.f32 %v1946_v42, %v1403_v30 }
0x112b   :  { %v1948_v43 = vpop.eup %1947 }
0x112c   :  { %v1425_v45 = vmul.f32 %v1424_v41, %v1419_v29  ;;  %v1420_v10 = vmul.f32 %v1948_v43, %v1404_v32 }
0x112e   :  { %v1426_v18 = vmul.f32 %v1424_v41, %v1420_v10  ;;  %v1431_v46 = vadd.f32 %v1430_v44, %v1425_v45 }
0x1130   :  { %v1432_v47 = vadd.f32 %v1430_v44, %v1426_v18 }
0x1132   :  { %v1433_v48 = vpack.c.bf16 %v1432_v47, %v1431_v46 }
0x1134   :  { %1864 = vmatmul.mubr.msk.bf16.vlgmr.msra.gmra.mrb[44].mxu0 %vm125_vm1, %v1433_v48 }
0x1207   :  { %v1487_v52 = vpop.f32.mrb[44].mxu0 }
0x1208   :  { %v1488_v59 = vadd.f32 %v1487_v52, %v1437_v51  ;;  %v1865_v56 = vpop.f32.mrb[45].mxu0 }
0x1209   :  { %v1490_v57 = vpop.f32.mrb[46].mxu0 }
0x120a   :  { %v1491_v58 = vadd.f32 %v1490_v57, %v1437_v51  ;;  %v1866_v60 = vpop.f32.mrb[47].mxu0  ;;  %v1494_v61 = vmax.f32 %v1488_v59, 0.0 }
0x120c   :  { %v1495_v62 = vmax.f32 %v1491_v58, 0.0 }
0x120e   :  { %v1496_v1 = vpack.c.bf16 %v1495_v62, %v1494_v61 }
0x1210   :  { %1876 = vmatmul.mubr.msk.bf16.vlgmr.msra.gmra.mrb[44].mxu1 %vm1525_vm6, %v1496_v1 }
0x12e3   :  { %v1563_v11 = vpop.f32.mrb[44].mxu1 }
0x12e4   :  { %v1564_v13 = vadd.f32 %v1563_v11, %v1500_v6  ;;  %v1877_v14 = vpop.f32.mrb[45].mxu1 }
0x12e5   :  { %v1566_v16 = vpop.f32.mrb[46].mxu1 }
0x12e6   :  { %v1567_v9 = vadd.f32 %v1566_v16, %v1500_v6  ;;  %v1878_v17 = vpop.f32.mrb[47].mxu1  ;;  %v1570_v19 = vadd.f32 %v1564_v13, %v1431_v46 }
0x12e8   :  { %v1572_v20 = vsel %vm125_vm1, %v1570_v19, 0.0  ;;  %v1571_v21 = vadd.f32 %v1567_v9, %v1432_v47 }
0x12e9   :  { %1573 = vadd.xlane.f32.xlu1 %v1572_v20 }
0x12ea   :  { %v1575_v22 = vsel %vm125_vm1, %v1571_v21, 0.0 }
0x12eb   :  { %1576 = vadd.xlane.f32.xlu0 %v1575_v22 }
0x1376   :  { %v1574_v23 = vpop.xlane.xlu1 %1573 }
0x1377   :  { %v1578_v24 = vmul.f32 0.03125, %v1574_v23 }
0x1378   :  { %v1577_v25 = vpop.xlane.xlu0 %1576 }
0x1379   :  { %v1580_v26 = vsub.f32 %v1570_v19, %v1578_v24  ;;  %v1579_v27 = vmul.f32 0.03125, %v1577_v25 }
0x137b   :  { %v1581_v28 = vsub.f32 %v1571_v21, %v1579_v27  ;;  %v1582_v30 = vmul.f32 %v1580_v26, %v1580_v26 }
0x137d   :  { %v1584_v31 = vsel %vm125_vm1, %v1582_v30, 0.0  ;;  %v1583_v32 = vmul.f32 %v1581_v28, %v1581_v28 }
0x137e   :  { %1585 = vadd.xlane.f32.xlu1 %v1584_v31 }
0x137f   :  { %v1587_v33 = vsel %vm125_vm1, %v1583_v32, 0.0 }
0x1380   :  { %1588 = vadd.xlane.f32.xlu0 %v1587_v33 }
0x140b   :  { %v1586_v53 = vpop.xlane.xlu1 %1585 }
0x140c   :  { %v1590_v54 = vmul.f32 0.03125, %v1586_v53 }
0x140d   :  { %v1589_v15 = vpop.xlane.xlu0 %1588 }
0x140e   :  { %v1592_v34 = vadd.f32 1e-05, %v1590_v54  ;;  %v1591_v55 = vmul.f32 0.03125, %v1589_v15 }
0x1410   :  { %1949 = vrsqrt.f32 %v1592_v34  ;;  %v1593_v35 = vadd.f32 1e-05, %v1591_v55 }
0x1412   :  { %1951 = vrsqrt.f32 %v1593_v35 }
0x141a   :  { %v1950_v37 = vpop.eup %1949 }
0x141b   :  { %v1596_v2 = vmul.f32 %v1950_v37, %v1580_v26 }
0x141c   :  { %v1952_v38 = vpop.eup %1951 }
0x141d   :  { %v1597_v4 = vmul.f32 %v1952_v38, %v1581_v28  ;;  %v1602_v39 = vmul.f32 %v1601_v36, %v1596_v2 }
0x141f   :  { %v1603_v41 = vmul.f32 %v1601_v36, %v1597_v4  ;;  %v1608_v42 = vadd.f32 %v1607_v3, %v1602_v39 }
0x1421   :  { %v1609_v29 = vadd.f32 %v1607_v3, %v1603_v41  ;;  %1610 = vst.msk [vmem:[#allocation10] sm:$0xff] %vm125_vm1, %v1608_v42 }
0x1423   :  { %1611 = vst.msk [vmem:[#allocation10 + $0x8] sm:$0xff] %vm125_vm1, %v1609_v29 }
0x1424   :  { %2053 = shalt.err (!%p2050_p8)
}
0x1425   :  { %s2054_s22 = scalar_lea.hbm %s2467_s4, 256 }
0x1426   :  { %p2055_p9 = scmp.ne.s32.totalorder %s2467_s4, %s2054_s22  ;;  %p2058_p10 = scmp.lt.u32.totalorder %s2054_s22, %s2467_s4 }
0x1428   :  { %p2060_p11 = pnand %p2058_p10, %p2055_p9 }
0x142a   :  { %2063 = shalt.err (!%p2060_p11)
}
0x142b   :  { %1623 = dma.vmem_to_hbm [thread:$0]  %s1618_s17, 256, %s2467_s4, [#allocation4], %s2074_s27, %s2074_s27, %s2075_s28  }
0x142c   :  { %2070 = dma.done.wait [#allocation4], 256  }
0x142d   :  { %2071 = vsyncadd [#allocation4], 4294967040 }
0x142e   :  { %1627 = vsyncpa [#allocation3], 1 }
0x142f   :  { %1628 = vsyncpa [#allocation6], 1 }
0x1430   :  { %1629 = vsyncpa [#allocation9], 1 }
0x1431   :  { %1630 = vsyncpa [#allocation4], 1 }

</bundles_post_ra>
